<compile_context>
chip_gen: v7x
topology: tpu7x:2x2x1
jax: 0.10.0
libtpu: 0.0.40
codegen_flags: <defaults>
</compile_context>

<pallas_src>
import functools

import jax
import jax.numpy as jnp
from jax.experimental import pallas as pl
from jax.experimental.pallas import tpu as pltpu


def _mmp_balance_kernel(wb_ref, pos_ref, prox_ref, anc_ref, proxT_ref, dedup_ref,
                        loss_ref, prec_ref, acc_ref, *, lam, n_classes, class_tile):
    c = pl.program_id(0)
    w = wb_ref[0]
    b = wb_ref[1]

    @pl.when(c == 0)
    def _():
        acc_ref[...] = jnp.zeros_like(acc_ref)

    # ---- streaming part: exp-sum over this tile of classes -----------------
    P = prox_ref[...]                                              # (TC, D)
    inv = jax.lax.rsqrt(jnp.maximum(jnp.sum(P * P, axis=1, keepdims=True), 1e-24))
    Pw = P * (inv * w)                                             # normalize + fold w
    # S = w * (out_positive @ normalize(P).T)  -> (B, TC) on the MXU
    S = jax.lax.dot_general(pos_ref[...], Pw, (((1,), (1,)), ((), ())),
                            preferred_element_type=jnp.float32)
    e = jnp.exp(S - b)
    if n_classes % class_tile != 0:
        # zero the zero-padded proxy columns of the last (partial) tile
        col = c * class_tile + jax.lax.broadcasted_iota(jnp.int32, e.shape, 1)
        e = jnp.where(col < n_classes, e, 0.0)
    acc_ref[...] += e                                              # lane-wise partials

    # ---- fused epilogue: BxB losses + prec1 on the last tile ---------------
    @pl.when(c == pl.num_programs(0) - 1)
    def _():
        pos = pos_ref[...]            # (B, D) out_positive (unnormalized)
        anc = anc_ref[...]            # (B, D) out_anchor   (unnormalized)
        proxT = proxT_ref[...]        # (B, D) proxies[T]   (unnormalized)
        dedup = dedup_ref[...]        # (1, B) 1.0 at first occurrence of each label
        Bsz = pos.shape[0]

        A = anc * jax.lax.rsqrt(jnp.sum(anc * anc, axis=1, keepdims=True) + 1e-12)
        PnT = proxT * jax.lax.rsqrt(
            jnp.maximum(jnp.sum(proxT * proxT, axis=1, keepdims=True), 1e-24))

        diag = (jax.lax.broadcasted_iota(jnp.int32, (Bsz, Bsz), 0) ==
                jax.lax.broadcasted_iota(jnp.int32, (Bsz, Bsz), 1))

        # S1 = F.linear(out_positive, l2_norm(out_anchor))  -> (B, B)
        S1 = jnp.dot(pos, A.T, preferred_element_type=jnp.float32)
        d = jnp.sum(jnp.where(diag, S1, 0.0), axis=1, keepdims=True)

        # l1 = log( sum_i exp(-<pos_i, A_i> * w + b) + 1 )
        l1 = jnp.log(jnp.sum(jnp.exp(-d * w + b), axis=0, keepdims=True) + 1.0)

        # l3 = mean_i log( sum_j z_ij - z_ii + 1 ),  z = exp(S1*w - b)
        z = jnp.exp(S1 * w - b)
        zsum = jnp.sum(z, axis=1, keepdims=True)
        zdiag = jnp.sum(jnp.where(diag, z, 0.0), axis=1, keepdims=True)
        l3 = jnp.sum(jnp.log(zsum - zdiag + 1.0), axis=0, keepdims=True) * (1.0 / Bsz)

        # l2: full-class exp-sum (accumulated in acc_ref) minus in-batch classes.
        # TODO(synk): l1/l3 assume distinct labels in T (PyTorch's new_center[T]
        # scatter is last-write-wins for duplicates); l2 handles duplicates via dedup.
        Sb = jnp.dot(pos, PnT.T, preferred_element_type=jnp.float32)   # (B, B)
        eb = jnp.exp(Sb * w - b) * dedup
        row_all = jnp.sum(acc_ref[...], axis=1, keepdims=True)          # (B, 1)
        row_batch = jnp.sum(eb, axis=1, keepdims=True)
        l2 = jnp.sum(jnp.log(row_all - row_batch + 1.0), axis=0,
                     keepdims=True) * (1.0 / Bsz)

        # regularizer: CE(out_anchor @ normalize(proxies[T]).T * w - b, arange(B))
        cos2 = jnp.dot(anc, PnT.T, preferred_element_type=jnp.float32) * w - b
        rowmax = jnp.max(cos2, axis=1, keepdims=True)
        lse = jnp.log(jnp.sum(jnp.exp(cos2 - rowmax), axis=1, keepdims=True)) + rowmax
        cdiag = jnp.sum(jnp.where(diag, cos2, 0.0), axis=1, keepdims=True)
        loss_reg = jnp.sum(lse - cdiag, axis=0, keepdims=True) * (1.0 / Bsz)

        loss_ref[...] = l1 + l2 + l3 + lam * loss_reg

        # prec1: top-1 accuracy (percent), label = arange(B), first-argmax tiebreak
        colb = jax.lax.broadcasted_iota(jnp.int32, (Bsz, Bsz), 1)
        amax = jnp.min(jnp.where(cos2 == rowmax, colb, Bsz), axis=1, keepdims=True)
        rowi = jax.lax.broadcasted_iota(jnp.int32, (Bsz, 1), 0)
        prec_ref[...] = jnp.sum((amax == rowi).astype(jnp.float32),
                                axis=0, keepdims=True) * (100.0 / Bsz)


def _round_up(x, m):
    return ((x + m - 1) // m) * m


def mmp_balance_forward(X, T, proxies, w, b, lam=0.5, class_tile=1024):
    """JAX/Pallas equivalent of MMP_Balance.forward(X, T) -> (loss, prec1)."""
    B, M, D = X.shape
    nC = proxies.shape[0]
    assert M >= 2

    # ---- plain-JAX glue (index bookkeeping / tiny prep) ---------------------
    X = X.astype(jnp.float32)
    out_anchor = jnp.mean(X[:, 1:, :], axis=1)               # (B, D)
    out_positive = X[:, 0, :]                                # (B, D)
    proxies = proxies.astype(jnp.float32)
    proxies_T = jnp.take(proxies, T, axis=0)                 # (B, D)

    # first-occurrence weights: duplicate labels in T are subtracted only once
    idx = jnp.arange(B)
    earlier_same = (T[None, :] == T[:, None]) & (idx[None, :] < idx[:, None])
    dedup = jnp.where(jnp.any(earlier_same, axis=1), 0.0, 1.0)
    dedup = dedup.reshape(1, B).astype(jnp.float32)

    wb = jnp.stack([jnp.asarray(w, jnp.float32), jnp.asarray(b, jnp.float32)])

    # ---- class tiling (pad to a tile multiple; tile is perf-chosen) ---------
    class_tile = max(128, (int(class_tile) // 128) * 128)
    class_tile = min(class_tile, _round_up(nC, 128))
    num_tiles = -(-nC // class_tile)
    nC_pad = num_tiles * class_tile
    proxies_p = proxies if nC_pad == nC else jnp.pad(
        proxies, ((0, nC_pad - nC), (0, 0)))

    kernel = functools.partial(_mmp_balance_kernel, lam=float(lam),
                               n_classes=nC, class_tile=class_tile)

    loss, prec1 = pl.pallas_call(
        kernel,
        out_shape=(jax.ShapeDtypeStruct((1, 1), jnp.float32),
                   jax.ShapeDtypeStruct((1, 1), jnp.float32)),
        grid_spec=pltpu.PrefetchScalarGridSpec(
            num_scalar_prefetch=0,
            grid=(num_tiles,),
            in_specs=[
                pl.BlockSpec(memory_space=pltpu.MemorySpace.SMEM),    # [w, b]
                pl.BlockSpec((B, D), lambda c: (0, 0)),               # out_positive (resident)
                pl.BlockSpec((class_tile, D), lambda c: (c, 0)),      # streamed proxy tile
                pl.BlockSpec((B, D), lambda c: (0, 0)),               # out_anchor (resident)
                pl.BlockSpec((B, D), lambda c: (0, 0)),               # proxies[T] (resident)
                pl.BlockSpec((1, B), lambda c: (0, 0)),               # dedup weights
            ],
            out_specs=(pl.BlockSpec((1, 1), lambda c: (0, 0)),
                       pl.BlockSpec((1, 1), lambda c: (0, 0))),
            scratch_shapes=[pltpu.VMEM((B, class_tile), jnp.float32)],
        ),
        compiler_params=pltpu.CompilerParams(
            dimension_semantics=("arbitrary",)),
    )(wb, out_positive, proxies_p, out_anchor, proxies_T, dedup)

    return loss[0, 0], prec1[0, 0]


def _reference_forward(X, T, proxies, w, b, lam=0.5):
    """Pure-JAX reference mirroring the PyTorch forward, for a sanity check."""
    B = X.shape[0]
    nC = proxies.shape[0]
    out_anchor = jnp.mean(X[:, 1:, :], axis=1)
    out_positive = X[:, 0, :]
    P = proxies / jnp.maximum(jnp.linalg.norm(proxies, axis=1, keepdims=True), 1e-12)
    A = out_anchor / jnp.sqrt(jnp.sum(out_anchor ** 2, axis=1, keepdims=True) + 1e-12)
    mask = jnp.zeros((nC,)).at[T].set(1.0)
    S_all = out_positive @ P.T
    l2row = jnp.sum(jnp.exp(S_all * w - b) * (1.0 - mask)[None, :], axis=1)
    l2 = jnp.mean(jnp.log(l2row + 1.0))
    dpos = jnp.sum(out_positive * A, axis=1)
    l1 = jnp.log(jnp.sum(jnp.exp(-dpos * w + b)) + 1.0)
    z = jnp.exp((out_positive @ A.T) * w - b)
    l3 = jnp.mean(jnp.log(jnp.sum(z, axis=1) - jnp.diag(z) + 1.0))
    cos2 = (out_anchor @ P[T].T) * w - b
    lbl = jnp.arange(B)
    lse = jax.scipy.special.logsumexp(cos2, axis=1)
    loss_reg = jnp.mean(lse - cos2[lbl, lbl])
    loss = l1 + l2 + l3 + lam * loss_reg
    prec1 = jnp.mean((jnp.argmax(cos2, axis=1) == lbl).astype(jnp.float32)) * 100.0
    return loss, prec1


if __name__ == "__main__":
    key = jax.random.PRNGKey(0)
    kx, kp = jax.random.split(key)

    # Small shapes consistent with the module: nOut=128, nClasses=600 (deliberately
    # not a tile multiple, to exercise the padding/remainder path), 3 utterances.
    B, M, D, nC = 8, 3, 128, 600
    X = 0.3 * jax.random.normal(kx, (B, M, D), jnp.float32)
    T = (jnp.arange(B, dtype=jnp.int32) * 53 + 11) % nC       # distinct labels < nC
    # kaiming_normal_(mode='fan_out') on (nClasses, nOut): std = sqrt(2 / nClasses)
    proxies = jax.random.normal(kp, (nC, D), jnp.float32) * jnp.sqrt(2.0 / nC)
    w_init = jnp.float32(10.0)
    b_init = jnp.float32(-5.0)

    loss, prec1 = mmp_balance_forward(X, T, proxies, w_init, b_init,
                                      lam=0.5, class_tile=256)
    jax.block_until_ready((loss, prec1))

    ref_loss, ref_prec1 = _reference_forward(X, T, proxies, w_init, b_init, lam=0.5)
    assert jnp.allclose(loss, ref_loss, rtol=1e-2, atol=1e-2), (loss, ref_loss)
    assert jnp.allclose(prec1, ref_prec1, rtol=1e-2, atol=1e-2), (prec1, ref_prec1)

    print("KERNEL_OK")
</pallas_src>

<mosaic_0001>
module attributes {stable_mosaic.version = 11 : i64} {
  func.func @_mmp_balance_kernel(%arg0: i32, %arg1: memref<2xf32, #tpu.memory_space<smem>>, %arg2: memref<8x128xf32, #tpu.memory_space<vmem>>, %arg3: memref<256x128xf32, #tpu.memory_space<vmem>>, %arg4: memref<8x128xf32, #tpu.memory_space<vmem>>, %arg5: memref<8x128xf32, #tpu.memory_space<vmem>>, %arg6: memref<1x8xf32, #tpu.memory_space<vmem>>, %arg7: memref<1x1xf32, #tpu.memory_space<vmem>>, %arg8: memref<1x1xf32, #tpu.memory_space<vmem>>, %arg9: memref<8x256xf32, #tpu.memory_space<vmem>>) attributes {dimension_semantics = [#tpu.dimension_semantics<arbitrary>], iteration_bounds = array<i64: 3>, scalar_prefetch = 0 : i64, scratch_operands = 1 : i64, tpu.core_type = #tpu.core_type<tc>, window_params = [{transform_indices = @transform_0, window_bounds = array<i64: 2>}, {pipeline_mode = #tpu.pipeline_mode<synchronous>, transform_indices = @transform_1, window_bounds = array<i64: 8, 128>}, {transform_indices = @transform_2, window_bounds = array<i64: 256, 128>}, {pipeline_mode = #tpu.pipeline_mode<synchronous>, transform_indices = @transform_3, window_bounds = array<i64: 8, 128>}, {pipeline_mode = #tpu.pipeline_mode<synchronous>, transform_indices = @transform_4, window_bounds = array<i64: 8, 128>}, {pipeline_mode = #tpu.pipeline_mode<synchronous>, transform_indices = @transform_5, window_bounds = array<i64: 1, 8>}, {pipeline_mode = #tpu.pipeline_mode<synchronous>, transform_indices = @transform_6, window_bounds = array<i64: 1, 1>}, {pipeline_mode = #tpu.pipeline_mode<synchronous>, transform_indices = @transform_7, window_bounds = array<i64: 1, 1>}]} {
    %c0 = arith.constant 0 : index
    %0 = memref.load %arg1[%c0] : memref<2xf32, #tpu.memory_space<smem>>
    %c1 = arith.constant 1 : index
    %1 = memref.load %arg1[%c1] : memref<2xf32, #tpu.memory_space<smem>>
    %c0_i32 = arith.constant 0 : i32
    %2 = arith.cmpi eq, %arg0, %c0_i32 : i32
    %3 = arith.extui %2 : i1 to i32
    %c0_i32_0 = arith.constant 0 : i32
    %4 = arith.cmpi ne, %3, %c0_i32_0 : i32
    scf.if %4 {
      %cst_13 = arith.constant 0.000000e+00 : f32
      %35 = vector.broadcast %cst_13 : f32 to vector<8x256xf32>
      %c0_14 = arith.constant 0 : index
      %c0_15 = arith.constant 0 : index
      %36 = vector.load %arg9[%c0_14, %c0_15] : memref<8x256xf32, #tpu.memory_space<vmem>>, vector<8x256xf32>
      tpu.vector_store %arg9[%c0_14, %c0_15], %35 {strides = array<i32>} : memref<8x256xf32, #tpu.memory_space<vmem>>, vector<8x256xf32>,
    } else {
    }
    %c0_1 = arith.constant 0 : index
    %c0_2 = arith.constant 0 : index
    %5 = vector.load %arg3[%c0_1, %c0_2] : memref<256x128xf32, #tpu.memory_space<vmem>>, vector<256x128xf32>
    %6 = arith.mulf %5, %5 : vector<256x128xf32>
    %cst = arith.constant dense<0.000000e+00> : vector<256xf32>
    %7 = vector.multi_reduction <add>, %6, %cst [1] : vector<256x128xf32> to vector<256xf32>
    %8 = vector.shape_cast %7 : vector<256xf32> to vector<256x1xf32>
    %cst_3 = arith.constant 1.000000e-24 : f32
    %9 = vector.broadcast %cst_3 : f32 to vector<256x1xf32>
    %10 = arith.maximumf %8, %9 : vector<256x1xf32>
    %11 = math.rsqrt %10 : vector<256x1xf32>
    %12 = vector.broadcast %0 : f32 to vector<256x1xf32>
    %13 = arith.mulf %11, %12 : vector<256x1xf32>
    %14 = vector.broadcast %13 : vector<256x1xf32> to vector<256x128xf32>
    %15 = arith.mulf %5, %14 : vector<256x128xf32>
    %c0_4 = arith.constant 0 : index
    %c0_5 = arith.constant 0 : index
    %16 = vector.load %arg2[%c0_4, %c0_5] : memref<8x128xf32, #tpu.memory_space<vmem>>, vector<8x128xf32>
    %cst_6 = arith.constant dense<0.000000e+00> : vector<8x256xf32>
    %17 = tpu.matmul %16, %15, %cst_6 {dimension_numbers = #tpu.dot_dimension_numbers<[1], [1], [0], [0], [0, 0, 1, 0], [], []>} : vector<8x128xf32>, vector<256x128xf32>, vector<8x256xf32> -> vector<8x256xf32>
    %18 = vector.broadcast %1 : f32 to vector<8x256xf32>
    %19 = arith.subf %17, %18 : vector<8x256xf32>
    %20 = math.exp %19 : vector<8x256xf32>
    %c256_i32 = arith.constant 256 : i32
    %21 = arith.muli %arg0, %c256_i32 : i32
    %22 = tpu.iota {dimensions = array<i32: 1>} : vector<8x256xi32>
    %23 = vector.broadcast %21 : i32 to vector<8x256xi32>
    %24 = arith.addi %23, %22 : vector<8x256xi32>
    %c600_i32 = arith.constant 600 : i32
    %25 = vector.broadcast %c600_i32 : i32 to vector<8x256xi32>
    %26 = arith.cmpi slt, %24, %25 : vector<8x256xi32>
    %cst_7 = arith.constant 0.000000e+00 : f32
    %27 = vector.broadcast %cst_7 : f32 to vector<8x256xf32>
    %28 = arith.select %26, %20, %27 : vector<8x256xi1>, vector<8x256xf32>
    %c0_8 = arith.constant 0 : index
    %c0_9 = arith.constant 0 : index
    %29 = vector.load %arg9[%c0_8, %c0_9] : memref<8x256xf32, #tpu.memory_space<vmem>>, vector<8x256xf32>
    %30 = arith.addf %29, %28 : vector<8x256xf32>
    %c0_10 = arith.constant 0 : index
    %c0_11 = arith.constant 0 : index
    %31 = vector.load %arg9[%c0_10, %c0_11] : memref<8x256xf32, #tpu.memory_space<vmem>>, vector<8x256xf32>
    tpu.vector_store %arg9[%c0_10, %c0_11], %30 {strides = array<i32>} : memref<8x256xf32, #tpu.memory_space<vmem>>, vector<8x256xf32>,
    %c2_i32 = arith.constant 2 : i32
    %32 = arith.cmpi eq, %arg0, %c2_i32 : i32
    %33 = arith.extui %32 : i1 to i32
    %c0_i32_12 = arith.constant 0 : i32
    %34 = arith.cmpi ne, %33, %c0_i32_12 : i32
    scf.if %34 {
      %c0_13 = arith.constant 0 : index
      %c0_14 = arith.constant 0 : index
      %35 = vector.load %arg2[%c0_13, %c0_14] : memref<8x128xf32, #tpu.memory_space<vmem>>, vector<8x128xf32>
      %c0_15 = arith.constant 0 : index
      %c0_16 = arith.constant 0 : index
      %36 = vector.load %arg4[%c0_15, %c0_16] : memref<8x128xf32, #tpu.memory_space<vmem>>, vector<8x128xf32>
      %c0_17 = arith.constant 0 : index
      %c0_18 = arith.constant 0 : index
      %37 = vector.load %arg5[%c0_17, %c0_18] : memref<8x128xf32, #tpu.memory_space<vmem>>, vector<8x128xf32>
      %c0_19 = arith.constant 0 : index
      %c0_20 = arith.constant 0 : index
      %38 = vector.load %arg6[%c0_19, %c0_20] : memref<1x8xf32, #tpu.memory_space<vmem>>, vector<1x8xf32>
      %39 = arith.mulf %36, %36 : vector<8x128xf32>
      %cst_21 = arith.constant dense<0.000000e+00> : vector<8xf32>
      %40 = vector.multi_reduction <add>, %39, %cst_21 [1] : vector<8x128xf32> to vector<8xf32>
      %41 = vector.shape_cast %40 : vector<8xf32> to vector<8x1xf32>
      %cst_22 = arith.constant 9.99999996E-13 : f32
      %42 = vector.broadcast %cst_22 : f32 to vector<8x1xf32>
      %43 = arith.addf %41, %42 : vector<8x1xf32>
      %44 = math.rsqrt %43 : vector<8x1xf32>
      %45 = vector.broadcast %44 : vector<8x1xf32> to vector<8x128xf32>
      %46 = arith.mulf %36, %45 : vector<8x128xf32>
      %47 = arith.mulf %37, %37 : vector<8x128xf32>
      %cst_23 = arith.constant dense<0.000000e+00> : vector<8xf32>
      %48 = vector.multi_reduction <add>, %47, %cst_23 [1] : vector<8x128xf32> to vector<8xf32>
      %49 = vector.shape_cast %48 : vector<8xf32> to vector<8x1xf32>
      %cst_24 = arith.constant 1.000000e-24 : f32
      %50 = vector.broadcast %cst_24 : f32 to vector<8x1xf32>
      %51 = arith.maximumf %49, %50 : vector<8x1xf32>
      %52 = math.rsqrt %51 : vector<8x1xf32>
      %53 = vector.broadcast %52 : vector<8x1xf32> to vector<8x128xf32>
      %54 = arith.mulf %37, %53 : vector<8x128xf32>
      %55 = tpu.iota {dimensions = array<i32: 0>} : vector<8x8xi32>
      %56 = tpu.iota {dimensions = array<i32: 1>} : vector<8x8xi32>
      %57 = arith.cmpi eq, %55, %56 : vector<8x8xi32>
      %58 = tpu.transpose %46, [1, 0] : vector<8x128xf32> -> vector<128x8xf32>
      %cst_25 = arith.constant dense<0.000000e+00> : vector<8x8xf32>
      %59 = tpu.matmul %35, %58, %cst_25 {dimension_numbers = #tpu.dot_dimension_numbers<[1], [0], [0], [1], [0, 0, 1, 1], [], []>} : vector<8x128xf32>, vector<128x8xf32>, vector<8x8xf32> -> vector<8x8xf32>
      %cst_26 = arith.constant 0.000000e+00 : f32
      %60 = vector.broadcast %cst_26 : f32 to vector<8x8xf32>
      %61 = arith.select %57, %59, %60 : vector<8x8xi1>, vector<8x8xf32>
      %cst_27 = arith.constant dense<0.000000e+00> : vector<8xf32>
      %62 = vector.multi_reduction <add>, %61, %cst_27 [1] : vector<8x8xf32> to vector<8xf32>
      %63 = vector.shape_cast %62 : vector<8xf32> to vector<8x1xf32>
      %cst_28 = arith.constant 0.000000e+00 : f32
      %64 = vector.broadcast %cst_28 : f32 to vector<8x1xf32>
      %65 = arith.subf %64, %63 : vector<8x1xf32>
      %66 = vector.broadcast %0 : f32 to vector<8x1xf32>
      %67 = arith.mulf %65, %66 : vector<8x1xf32>
      %68 = vector.broadcast %1 : f32 to vector<8x1xf32>
      %69 = arith.addf %67, %68 : vector<8x1xf32>
      %70 = math.exp %69 : vector<8x1xf32>
      %cst_29 = arith.constant dense<0.000000e+00> : vector<1xf32>
      %71 = vector.multi_reduction <add>, %70, %cst_29 [0] : vector<8x1xf32> to vector<1xf32>
      %72 = vector.shape_cast %71 : vector<1xf32> to vector<1x1xf32>
      %cst_30 = arith.constant 1.000000e+00 : f32
      %73 = vector.broadcast %cst_30 : f32 to vector<1x1xf32>
      %74 = arith.addf %72, %73 : vector<1x1xf32>
      %75 = math.log %74 : vector<1x1xf32>
      %76 = vector.broadcast %0 : f32 to vector<8x8xf32>
      %77 = arith.mulf %59, %76 : vector<8x8xf32>
      %78 = vector.broadcast %1 : f32 to vector<8x8xf32>
      %79 = arith.subf %77, %78 : vector<8x8xf32>
      %80 = math.exp %79 : vector<8x8xf32>
      %cst_31 = arith.constant dense<0.000000e+00> : vector<8xf32>
      %81 = vector.multi_reduction <add>, %80, %cst_31 [1] : vector<8x8xf32> to vector<8xf32>
      %82 = vector.shape_cast %81 : vector<8xf32> to vector<8x1xf32>
      %cst_32 = arith.constant 0.000000e+00 : f32
      %83 = vector.broadcast %cst_32 : f32 to vector<8x8xf32>
      %84 = arith.select %57, %80, %83 : vector<8x8xi1>, vector<8x8xf32>
      %cst_33 = arith.constant dense<0.000000e+00> : vector<8xf32>
      %85 = vector.multi_reduction <add>, %84, %cst_33 [1] : vector<8x8xf32> to vector<8xf32>
      %86 = vector.shape_cast %85 : vector<8xf32> to vector<8x1xf32>
      %87 = arith.subf %82, %86 : vector<8x1xf32>
      %cst_34 = arith.constant 1.000000e+00 : f32
      %88 = vector.broadcast %cst_34 : f32 to vector<8x1xf32>
      %89 = arith.addf %87, %88 : vector<8x1xf32>
      %90 = math.log %89 : vector<8x1xf32>
      %cst_35 = arith.constant dense<0.000000e+00> : vector<1xf32>
      %91 = vector.multi_reduction <add>, %90, %cst_35 [0] : vector<8x1xf32> to vector<1xf32>
      %92 = vector.shape_cast %91 : vector<1xf32> to vector<1x1xf32>
      %cst_36 = arith.constant 1.250000e-01 : f32
      %93 = vector.broadcast %cst_36 : f32 to vector<1x1xf32>
      %94 = arith.mulf %92, %93 : vector<1x1xf32>
      %95 = tpu.transpose %54, [1, 0] : vector<8x128xf32> -> vector<128x8xf32>
      %cst_37 = arith.constant dense<0.000000e+00> : vector<8x8xf32>
      %96 = tpu.matmul %35, %95, %cst_37 {dimension_numbers = #tpu.dot_dimension_numbers<[1], [0], [0], [1], [0, 0, 1, 1], [], []>} : vector<8x128xf32>, vector<128x8xf32>, vector<8x8xf32> -> vector<8x8xf32>
      %97 = vector.broadcast %0 : f32 to vector<8x8xf32>
      %98 = arith.mulf %96, %97 : vector<8x8xf32>
      %99 = vector.broadcast %1 : f32 to vector<8x8xf32>
      %100 = arith.subf %98, %99 : vector<8x8xf32>
      %101 = math.exp %100 : vector<8x8xf32>
      %102 = vector.broadcast %38 : vector<1x8xf32> to vector<8x8xf32>
      %103 = arith.mulf %101, %102 : vector<8x8xf32>
      %c0_38 = arith.constant 0 : index
      %c0_39 = arith.constant 0 : index
      %104 = vector.load %arg9[%c0_38, %c0_39] : memref<8x256xf32, #tpu.memory_space<vmem>>, vector<8x256xf32>
      %cst_40 = arith.constant dense<0.000000e+00> : vector<8xf32>
      %105 = vector.multi_reduction <add>, %104, %cst_40 [1] : vector<8x256xf32> to vector<8xf32>
      %106 = vector.shape_cast %105 : vector<8xf32> to vector<8x1xf32>
      %cst_41 = arith.constant dense<0.000000e+00> : vector<8xf32>
      %107 = vector.multi_reduction <add>, %103, %cst_41 [1] : vector<8x8xf32> to vector<8xf32>
      %108 = vector.shape_cast %107 : vector<8xf32> to vector<8x1xf32>
      %109 = arith.subf %106, %108 : vector<8x1xf32>
      %cst_42 = arith.constant 1.000000e+00 : f32
      %110 = vector.broadcast %cst_42 : f32 to vector<8x1xf32>
      %111 = arith.addf %109, %110 : vector<8x1xf32>
      %112 = math.log %111 : vector<8x1xf32>
      %cst_43 = arith.constant dense<0.000000e+00> : vector<1xf32>
      %113 = vector.multi_reduction <add>, %112, %cst_43 [0] : vector<8x1xf32> to vector<1xf32>
      %114 = vector.shape_cast %113 : vector<1xf32> to vector<1x1xf32>
      %cst_44 = arith.constant 1.250000e-01 : f32
      %115 = vector.broadcast %cst_44 : f32 to vector<1x1xf32>
      %116 = arith.mulf %114, %115 : vector<1x1xf32>
      %117 = tpu.transpose %54, [1, 0] : vector<8x128xf32> -> vector<128x8xf32>
      %cst_45 = arith.constant dense<0.000000e+00> : vector<8x8xf32>
      %118 = tpu.matmul %36, %117, %cst_45 {dimension_numbers = #tpu.dot_dimension_numbers<[1], [0], [0], [1], [0, 0, 1, 1], [], []>} : vector<8x128xf32>, vector<128x8xf32>, vector<8x8xf32> -> vector<8x8xf32>
      %119 = vector.broadcast %0 : f32 to vector<8x8xf32>
      %120 = arith.mulf %118, %119 : vector<8x8xf32>
      %121 = vector.broadcast %1 : f32 to vector<8x8xf32>
      %122 = arith.subf %120, %121 : vector<8x8xf32>
      %cst_46 = arith.constant dense<0xFF800000> : vector<8xf32>
      %123 = vector.multi_reduction <maximumf>, %122, %cst_46 [1] : vector<8x8xf32> to vector<8xf32>
      %124 = vector.shape_cast %123 : vector<8xf32> to vector<8x1xf32>
      %125 = vector.broadcast %124 : vector<8x1xf32> to vector<8x8xf32>
      %126 = arith.subf %122, %125 : vector<8x8xf32>
      %127 = math.exp %126 : vector<8x8xf32>
      %cst_47 = arith.constant dense<0.000000e+00> : vector<8xf32>
      %128 = vector.multi_reduction <add>, %127, %cst_47 [1] : vector<8x8xf32> to vector<8xf32>
      %129 = vector.shape_cast %128 : vector<8xf32> to vector<8x1xf32>
      %130 = math.log %129 : vector<8x1xf32>
      %131 = arith.addf %130, %124 : vector<8x1xf32>
      %cst_48 = arith.constant 0.000000e+00 : f32
      %132 = vector.broadcast %cst_48 : f32 to vector<8x8xf32>
      %133 = arith.select %57, %122, %132 : vector<8x8xi1>, vector<8x8xf32>
      %cst_49 = arith.constant dense<0.000000e+00> : vector<8xf32>
      %134 = vector.multi_reduction <add>, %133, %cst_49 [1] : vector<8x8xf32> to vector<8xf32>
      %135 = vector.shape_cast %134 : vector<8xf32> to vector<8x1xf32>
      %136 = arith.subf %131, %135 : vector<8x1xf32>
      %cst_50 = arith.constant dense<0.000000e+00> : vector<1xf32>
      %137 = vector.multi_reduction <add>, %136, %cst_50 [0] : vector<8x1xf32> to vector<1xf32>
      %138 = vector.shape_cast %137 : vector<1xf32> to vector<1x1xf32>
      %cst_51 = arith.constant 1.250000e-01 : f32
      %139 = vector.broadcast %cst_51 : f32 to vector<1x1xf32>
      %140 = arith.mulf %138, %139 : vector<1x1xf32>
      %141 = arith.addf %75, %116 : vector<1x1xf32>
      %142 = arith.addf %141, %94 : vector<1x1xf32>
      %cst_52 = arith.constant 5.000000e-01 : f32
      %143 = vector.broadcast %cst_52 : f32 to vector<1x1xf32>
      %144 = arith.mulf %143, %140 : vector<1x1xf32>
      %145 = arith.addf %142, %144 : vector<1x1xf32>
      %c0_53 = arith.constant 0 : index
      %c0_54 = arith.constant 0 : index
      %146 = vector.load %arg7[%c0_53, %c0_54] : memref<1x1xf32, #tpu.memory_space<vmem>>, vector<1x1xf32>
      tpu.vector_store %arg7[%c0_53, %c0_54], %145 {strides = array<i32>} : memref<1x1xf32, #tpu.memory_space<vmem>>, vector<1x1xf32>,
      %147 = tpu.iota {dimensions = array<i32: 1>} : vector<8x8xi32>
      %148 = vector.broadcast %124 : vector<8x1xf32> to vector<8x8xf32>
      %149 = arith.cmpf oeq, %122, %148 : vector<8x8xf32>
      %c8_i32 = arith.constant 8 : i32
      %150 = vector.broadcast %c8_i32 : i32 to vector<8x8xi32>
      %151 = arith.select %149, %147, %150 : vector<8x8xi1>, vector<8x8xi32>
      %cst_55 = arith.constant dense<2147483647> : vector<8xi32>
      %152 = vector.multi_reduction <minsi>, %151, %cst_55 [1] : vector<8x8xi32> to vector<8xi32>
      %153 = vector.shape_cast %152 : vector<8xi32> to vector<8x1xi32>
      %154 = tpu.iota {dimensions = array<i32: 0>} : vector<8x1xi32>
      %155 = arith.cmpi eq, %153, %154 : vector<8x1xi32>
      %156 = arith.extui %155 : vector<8x1xi1> to vector<8x1xi32>
      %157 = arith.sitofp %156 : vector<8x1xi32> to vector<8x1xf32>
      %cst_56 = arith.constant dense<0.000000e+00> : vector<1xf32>
      %158 = vector.multi_reduction <add>, %157, %cst_56 [0] : vector<8x1xf32> to vector<1xf32>
      %159 = vector.shape_cast %158 : vector<1xf32> to vector<1x1xf32>
      %cst_57 = arith.constant 1.250000e+01 : f32
      %160 = vector.broadcast %cst_57 : f32 to vector<1x1xf32>
      %161 = arith.mulf %159, %160 : vector<1x1xf32>
      %c0_58 = arith.constant 0 : index
      %c0_59 = arith.constant 0 : index
      %162 = vector.load %arg8[%c0_58, %c0_59] : memref<1x1xf32, #tpu.memory_space<vmem>>, vector<1x1xf32>
      tpu.vector_store %arg8[%c0_58, %c0_59], %161 {strides = array<i32>} : memref<1x1xf32, #tpu.memory_space<vmem>>, vector<1x1xf32>,
    } else {
    }
    return
  }
  func.func @transform_0(%arg0: i32) -> i32 {
    %c0_i32 = arith.constant 0 : i32
    %c0_i32_0 = arith.constant 0 : i32
    return %c0_i32 : i32
  }
  func.func @transform_1(%arg0: i32) -> (i32, i32) {
    %c0_i32 = arith.constant 0 : i32
    %c0_i32_0 = arith.constant 0 : i32
    %c0_i32_1 = arith.constant 0 : i32
    return %c0_i32, %c0_i32_0 : i32, i32
  }
  func.func @transform_2(%arg0: i32) -> (i32, i32) {
    %c0_i32 = arith.constant 0 : i32
    %c0_i32_0 = arith.constant 0 : i32
    return %arg0, %c0_i32 : i32, i32
  }
  func.func @transform_3(%arg0: i32) -> (i32, i32) {
    %c0_i32 = arith.constant 0 : i32
    %c0_i32_0 = arith.constant 0 : i32
    %c0_i32_1 = arith.constant 0 : i32
    return %c0_i32, %c0_i32_0 : i32, i32
  }
  func.func @transform_4(%arg0: i32) -> (i32, i32) {
    %c0_i32 = arith.constant 0 : i32
    %c0_i32_0 = arith.constant 0 : i32
    %c0_i32_1 = arith.constant 0 : i32
    return %c0_i32, %c0_i32_0 : i32, i32
  }
  func.func @transform_5(%arg0: i32) -> (i32, i32) {
    %c0_i32 = arith.constant 0 : i32
    %c0_i32_0 = arith.constant 0 : i32
    %c0_i32_1 = arith.constant 0 : i32
    return %c0_i32, %c0_i32_0 : i32, i32
  }
  func.func @transform_6(%arg0: i32) -> (i32, i32) {
    %c0_i32 = arith.constant 0 : i32
    %c0_i32_0 = arith.constant 0 : i32
    %c0_i32_1 = arith.constant 0 : i32
    return %c0_i32, %c0_i32_0 : i32, i32
  }
  func.func @transform_7(%arg0: i32) -> (i32, i32) {
    %c0_i32 = arith.constant 0 : i32
    %c0_i32_0 = arith.constant 0 : i32
    %c0_i32_1 = arith.constant 0 : i32
    return %c0_i32, %c0_i32_0 : i32, i32
  }
}

</mosaic_0001>

<bundles_post_ra>
// kernel: tpu_custom_call.1
= control target key start
LH: loop header
LB: loop body
LE: loop exit
PB: predicated region body
PF: predicated region fallthrough
CT: control target
= control target key end

     0   :  { %13 = vsyncpa [#allocation6], 0  ;;  %s2261_s0 = inlined_call_operand.hbm [shape: f32[2], index: 0, kind: input, shape index: {}]   ;;  %s2262_s1 = inlined_call_operand.hbm [shape: f32[8,128], index: 1, kind: input, shape index: {}]   ;;  %s2263_s2 = inlined_call_operand.hbm [shape: f32[768,128], index: 2, kind: input, shape index: {}]   ;;  %s2264_s3 = inlined_call_operand.vmem [shape: f32[8,128], index: 3, kind: input, shape index: {}]   ;;  %s2265_s4 = inlined_call_operand.hbm [shape: f32[8,128], index: 4, kind: input, shape index: {}]   ;;  %s2266_s5 = inlined_call_operand.vmem [shape: f32[1,8], index: 5, kind: input, shape index: {}]   ;;  %s2267_s6 = inlined_call_operand.hbm [shape: f32[1,1], index: 6, kind: output, shape index: {0}]   ;;  %s2268_s7 = inlined_call_operand.hbm [shape: f32[1,1], index: 7, kind: output, shape index: {1}]  }
   0x1   :  { %14 = vsyncpa [#allocation4], 0 }
   0x2   :  { %15 = vsyncpa [#allocation9], 0 }
   0x3   :  { %17 = vsyncpa [#allocation9 + $0x1], 0 }
   0x4   :  { %18 = vsyncpa [#allocation5], 0 }
   0x5   :  { %19 = vsyncpa [#allocation13], 0  ;;  %s1708_s24 = smov 0   ;;  %s1710_s25 = smov 0  }
   0x6   :  { %s1712_s26 = smov 0   ;;  %s1714_s27 = smov 0  }
   0x7 LB: > { %s1727_s28 = sadd.s32 4294967295, %s1655_s27   ;;  %s1730_s29 = sadd.s32 1, %s1655_s27   ;;  %s1655_s27 = sphi %s1714_s27, %s2293_s27   ;;  %s1651_s26 = sphi %s1712_s26, %s2292_s26   ;;  %s1647_s25 = sphi %s1710_s25, %s2291_s25   ;;  %s1643_s24 = sphi %s1708_s24, %s2290_s24  }
   0x8   : > { %s71_s30 = ssub.s32 %s1655_s27, %s1730_s29  ;;  %s74_s8 = sadd.s32 1, %s1651_s26 }
   0x9   : > { %p72_p0 = scmp.eq.s32.totalorder %s71_s30, 0  ;;  %p81_p1 = scmp.ne.s32.totalorder %s1651_s26, %s1647_s25 }
   0xa   : > { %p82_p2 = scmp.eq.s32.totalorder %s1655_s27, 0  ;;  %p87_p3 = scmp.ne.s32.totalorder %s1647_s25, %s1643_s24 }
   0xb   : > { %s1740_s9 = scalar_select %p72_p0, %s1651_s26, %s74_s8  }
   0xc   : > { %p1742_p4 = por %p82_p2, %p81_p1  ;;  %p2269_p5 = scmp.eq.s32.totalorder %s1727_s28, 0 }
   0xd   : > { %p1160_p6 = scmp.ge.s32.totalorder %s1655_s27, 1  ;;  %p203_p7 = scmp.lt.s32.totalorder %s1655_s27, 4 }
   0xe   : > { %p1751_p8 = por %p2269_p5, %p87_p3  ;;  %s1657_s13 = smov [#allocation10]  }
   0xf   : > { %p1756_p10 = pnand %p1160_p6, %p203_p7  ;;  %s239_s14 = sshll.u32 %s1657_s13, 4  ;;  %s240_s14 = int_to_ptr.vmem [resolvable:$true] %s239_s14 }
  0x10   : > { %s2274_s11 = scalar_select %p1751_p8, 1, 0 }
  0x11   : > { %s2275_s12 = scalar_select %p1756_p10, 1, 0 }
  0x12   : > { %p1295_p11 = pneg %p1756_p10  ;;  %p1312_p12 = scmp.lt.s32.totalorder %s1655_s27, 3 }
  0x13   : > { %s1658_s17 = smov [#allocation7]   ;;  %s1450_s21 = scalar_lea.hbm %s2265_s4, 128 }
  0x14   : > { %p1765_p13 = pnand %p1295_p11, %p2269_p5  ;;  %p1771_p0 = pnand %p1312_p12, %p1742_p4 }
  0x15   : > { %s225_s18 = sshll.u32 %s1658_s17, 4  ;;  %p1451_p1 = scmp.ne.s32.totalorder %s2265_s4, %s1450_s21  ;;  %s1775_s18 = int_to_ptr.vmem [resolvable:$true] %s225_s18 }
  0x16   : > { %s2277_s16 = scalar_select %p1771_p0, 1, 0 }
  0x17   : > { %p1785_p2 = pneg %p1765_p13  ;;  %p1457_p6 = scmp.lt.u32.totalorder %s1450_s21, %s2265_s4 }
  0x19   : > { %p1453_p3 = pnand %p1785_p2, %p1451_p1 }
  0x1b   : > { %p1454_p4 = pneg %p1453_p3 }
  0x1d   : > { %p1459_p7 = pnand %p1457_p6, %p1454_p4 }
  0x1f   : > { %1462 = shalt.err (!%p1459_p7)
}
  0x20   : > { %s1463_s10 = scalar_lea.vmem %s240_s14, 128  ;;  %p1471_p5 = scmp.lt.s32.totalorder %s240_s14, %s240_s14 }
  0x21   : > { %p1464_p11 = scmp.ne.s32.totalorder %s240_s14, %s1463_s10  ;;  %p1472_p8 = scmp.lt.s32.totalorder %s1463_s10, %s1463_s10 }
  0x23   : > { %p1466_p12 = pnand %p1464_p11, %p1785_p2  ;;  %p1473_p10 = por %p1472_p8, %p1471_p5 }
  0x25   : > { %p1467_p9 = pneg %p1466_p12 }
  0x27   : > { %p1474_p0 = pnand %p1473_p10, %p1467_p9 }
  0x29   : > { %1477 = shalt.err (!%p1474_p0)
}
  0x2a   : > { %1304 = dma.hbm_to_vmem [thread:$0]  (!%p1765_p13), %s2265_s4, 128, %s240_s14, [#allocation9]  }
  0x2b   : > { %s1478_s22 = scalar_lea.hbm %s2261_s0, 16 }
  0x2c   : > { %p1479_p1 = scmp.ne.s32.totalorder %s2261_s0, %s1478_s22  ;;  %p1485_p9 = scmp.lt.u32.totalorder %s1478_s22, %s2261_s0 }
  0x2e   : > { %p1481_p5 = pnand %p1479_p1, %p1785_p2 }
  0x30   : > { %p1482_p8 = pneg %p1481_p5 }
  0x32   : > { %p1487_p10 = pnand %p1485_p9, %p1482_p8 }
  0x34   : > { %1490 = shalt.err (!%p1487_p10)
}
  0x35   : > { %s1659_s13 = smov [#allocation3]   ;;  %s1491_s23 = scalar_lea.hbm %s2262_s1, 128 }
  0x36   : > { %1298 = dma.hbm_to_smem (!%p1765_p13), %s2261_s0, 16, %s1659_s13, [#allocation6]  }
  0x37   : > { %p1492_p0 = scmp.ne.s32.totalorder %s2262_s1, %s1491_s23  ;;  %p1498_p6 = scmp.lt.u32.totalorder %s1491_s23, %s2262_s1 }
  0x39   : > { %p1494_p3 = pnand %p1492_p0, %p1785_p2 }
  0x3b   : > { %p1495_p4 = pneg %p1494_p3 }
  0x3d   : > { %p1500_p7 = pnand %p1498_p6, %p1495_p4 }
  0x3f   : > { %1503 = shalt.err (!%p1500_p7)
}
  0x40   : > { %s1504_s10 = scalar_lea.vmem %s1775_s18, 128  ;;  %p1512_p5 = scmp.lt.s32.totalorder %s1775_s18, %s1775_s18 }
  0x41   : > { %p1505_p11 = scmp.ne.s32.totalorder %s1775_s18, %s1504_s10  ;;  %p1513_p8 = scmp.lt.s32.totalorder %s1504_s10, %s1504_s10 }
  0x43   : > { %p1507_p12 = pnand %p1505_p11, %p1785_p2  ;;  %p1514_p9 = por %p1513_p8, %p1512_p5 }
  0x45   : > { %p1508_p1 = pneg %p1507_p12 }
  0x47   : > { %p1515_p10 = pnand %p1514_p9, %p1508_p1 }
  0x49   : > { %1518 = shalt.err (!%p1515_p10)
}
  0x4a   : > { %1301 = dma.hbm_to_vmem [thread:$0]  (!%p1765_p13), %s2262_s1, 128, %s1775_s18, [#allocation4]  }
  0x4b   : > { %s255_s24 = sand.u32 1, %s1651_s26   ;;  %s1185_s17 = sshll.u32 %s1655_s27, 12 }
  0x4c   : > { %s1165_s14 = sshll.u32 %s255_s24, 8  ;;  %s1846_s23 = scalar_lea.hbm %s2263_s2, %s1185_s17 }
  0x4d   : > { %s257_s15 = scalar_lea.vmem [#allocation8], %s1165_s14  ;;  %s2279_s22 = sand.u32 1, %s1655_s27  }
  0x4e   : > { %s264_s30 = sshll.u32 %s257_s15, 4  ;;  %s1852_s8 = scalar_lea.sflag [#allocation9], %s2279_s22  ;;  %s1848_s30 = int_to_ptr.vmem [resolvable:$true] %s264_s30 }
  0x4f   : > { %s1519_s18 = scalar_lea.hbm %s1846_s23, 4096  ;;  %p2280_p2 = scmp.ne.s32.totalorder %s2277_s16, 0 }
  0x50   : > { %p1520_p13 = scmp.ne.s32.totalorder %s1846_s23, %s1519_s18  ;;  %s1524_s13 = scalar_lea.hbm %s2263_s2, 12288 }
  0x51   : > { %p1521_p0 = pneg %p2280_p2  ;;  %p1525_p6 = scmp.lt.u32.totalorder %s1846_s23, %s2263_s2 }
  0x52   : > { %p1526_p7 = scmp.lt.u32.totalorder %s1524_s13, %s1519_s18  ;;  %p1528_p12 = scmp.lt.u32.totalorder %s1519_s18, %s1846_s23 }
  0x53   : > { %p1522_p3 = pnand %p1521_p0, %p1520_p13 }
  0x54   : > { %p1527_p11 = por %p1526_p7, %p1525_p6 }
  0x55   : > { %p1523_p4 = pneg %p1522_p3 }
  0x56   : > { %p1529_p1 = por %p1528_p12, %p1527_p11 }
  0x58   : > { %p1530_p5 = pnand %p1529_p1, %p1523_p4 }
  0x5a   : > { %1533 = shalt.err (!%p1530_p5)
}
  0x5b   : > { %s1534_s27 = scalar_lea.vmem %s1848_s30, 4096  ;;  %s1660_s17 = smov [#allocation8]  }
  0x5c   : > { %p1535_p8 = scmp.ne.s32.totalorder %s1848_s30, %s1534_s27  ;;  %s1539_s20 = sshll.u32 %s1660_s17, 4  ;;  %s1540_s20 = int_to_ptr.vmem [resolvable:$false] %s1539_s20 }
  0x5d   : > { %s1541_s21 = scalar_lea.vmem %s1540_s20, 8192  ;;  %p1542_p13 = scmp.lt.s32.totalorder %s1848_s30, %s1540_s20 }
  0x5e   : > { %p1537_p9 = pnand %p1535_p8, %p1521_p0  ;;  %p1543_p3 = scmp.lt.s32.totalorder %s1541_s21, %s1534_s27 }
  0x60   : > { %p1538_p10 = pneg %p1537_p9  ;;  %p1544_p6 = por %p1543_p3, %p1542_p13 }
  0x62   : > { %p1545_p7 = pnand %p1544_p6, %p1538_p10 }
  0x64   : > { %1548 = shalt.err (!%p1545_p7)
}
  0x65   : > { %s1661_s15 = smov 128   ;;  %s1662_s22 = smov 8  }
  0x66   : > { %1308 = dma.hbm_to_vmem [thread:$0]  (!%p2280_p2), %s1846_s23, 4096, %s1848_s30, %s1852_s8, %s1661_s15, %s1661_s15, %s1662_s22  }
  0x67   : > { %p2281_p0 = scmp.ne.s32.totalorder %s2275_s12, 0 }
  0x68   : > { %p2282_p4 = scmp.eq.s32.totalorder (!%p2281_p0), %s1727_s28, 0 }
  0x69   : > { %276 = sbr.rel (%p2281_p0) target bundleno = 1327 (0x52f), region = 44 }
  0x70   : > { %1618 = dma.done.wait (%p2282_p4), [#allocation6], 16   ;;  %p2283_p11 = pmov %p2282_p4 }
  0x71   : > { %p2284_p12 = pmov %p2282_p4 }
  0x72   : > { %1620 = vsyncadd (%p2283_p11), [#allocation6], 4294967280 }
  0x73   : > { %1622 = dma.done.wait (%p2284_p12), [#allocation4], 128   ;;  %p2285_p1 = pmov %p2282_p4 }
  0x74   : > { %s286_s16 = sand.u32 1, %s1727_s28   ;;  %s288_s23 = sand.u32 1, %s1647_s25  }
  0x75   : > { %1624 = vsyncadd (%p2285_p1), [#allocation4], 4294967168  ;;  %s1171_s30 = sshll.u32 %s288_s23, 8  ;;  %s287_s12 = scalar_lea.sflag [#allocation9], %s286_s16 }
  0x76   : > { %s1892_s8 = scalar_lea.vmem [#allocation8], %s1171_s30  ;;  %p2286_p2 = scmp.ne.s32.totalorder %s2274_s11, 0 }
  0x78   : > { %1626 = dma.done.wait (%p2286_p2), %s287_s12, 4096  }
  0x79   : > { %1628 = vsyncadd (%p2286_p2), %s287_s12, 4294963200  ;;  %p2287_p5 = pmov %p2285_p1 }
  0x7a   : > { %p2288_p8 = pmov %p2285_p1 }
  0x7b   : > { %1630 = dma.done.wait (%p2287_p5), [#allocation9], 128  }
  0x7c   : > { %1632 = vsyncadd (%p2288_p8), [#allocation9], 4294967168 }
  0x7d   : > { %299 = sfence }
  0x7e   : > { %s1902_s18 = sld [smem:[#allocation3]]  ;;  %s1904_s10 = sld [smem:[#allocation3 + $0x1]] }
  0x7f   : > { %p2289_p9 = scmp.ne.s32.totalorder %s1727_s28, 0 }
  0x80   : > { %v1663_v0 = vmov (!%p2289_p9), 0.0  }
  0x81   : > { %327 = sbr.rel (%p2289_p9) target bundleno = 136 (0x88), region = 64  ;;  %328 = vst [vmem:[#allocation2] sm:$0xff] (!%p2289_p9), %v1663_v0  ;;  %329 = vst [vmem:[#allocation2 + $0x8] sm:$0xff] (!%p2289_p9), %v1663_v0 }
  0x88 PF: > { %v1909_v1 = vld [vmem:[%s1892_s8 + $0x80] sm:$0xff]  ;;  %v1915_v3 = vld [vmem:[%s1892_s8 + $0x88] sm:$0xff]  ;;  %v1929_v9 = vld [vmem:[%s1892_s8 + $0x90] sm:$0xff]  ;;  %s1175_s11 = sshll.u32 %s1727_s28, 8  ;;  %p1176_p10 = scmp.ne.s32.totalorder %s1727_s28, 2 }
  0x89   : > { %v1912_v2 = vld [vmem:[%s1892_s8] sm:$0xff]  ;;  %v378_v4 = vmul.f32 %v1909_v1, %v1909_v1  ;;  %v1922_v6 = vld [vmem:[%s1892_s8 + $0x8] sm:$0xff]  ;;  %v379_v7 = vmul.f32 %v1915_v3, %v1915_v3  ;;  %v1932_v10 = vld [vmem:[%s1892_s8 + $0x98] sm:$0xff]  ;;  %v380_v11 = vmul.f32 %v1929_v9, %v1929_v9  ;;  %vm1665_vm2 = vmmov (!%p1176_p10), 0  }
  0x8a   : > { %v362_v5 = vmul.f32 %v1912_v2, %v1912_v2  ;;  %v363_v8 = vmul.f32 %v1922_v6, %v1922_v6  ;;  %v381_v12 = vmul.f32 %v1932_v10, %v1932_v10  ;;  %v1939_v13 = vld [vmem:[%s1892_s8 + $0x10] sm:$0xff]  ;;  %v1942_v14 = vld [vmem:[%s1892_s8 + $0x18] sm:$0xff]  ;;  %v1949_v17 = vld [vmem:[%s1892_s8 + $0xa0] sm:$0xff]  ;;  %vm777_vm4 = vcmask (!%p1176_p10), 64512  }
  0x8b   : > { %426 = vadd.xlane.f32.xlu0 %v378_v4  ;;  %v364_v15 = vmul.f32 %v1939_v13, %v1939_v13  ;;  %v365_v16 = vmul.f32 %v1942_v14, %v1942_v14  ;;  %v1952_v18 = vld [vmem:[%s1892_s8 + $0xa8] sm:$0xff]  ;;  %v382_v19 = vmul.f32 %v1949_v17, %v1949_v17  ;;  %v1959_v21 = vld [vmem:[%s1892_s8 + $0x20] sm:$0xff]  ;;  %v1969_v25 = vld [vmem:[%s1892_s8 + $0xb0] sm:$0xff]  ;;  %vm1017_vm7 = vcmask (!%p1176_p10), 0  }
  0x8c   : > { %394 = vadd.xlane.f32.xlu1 %v362_v5  ;;  %v383_v20 = vmul.f32 %v1952_v18, %v1952_v18  ;;  %v1962_v22 = vld [vmem:[%s1892_s8 + $0x28] sm:$0xff]  ;;  %v366_v23 = vmul.f32 %v1959_v21, %v1959_v21  ;;  %v1972_v26 = vld [vmem:[%s1892_s8 + $0xb8] sm:$0xff]  ;;  %v384_v27 = vmul.f32 %v1969_v25, %v1969_v25  ;;  %v1979_v29 = vld [vmem:[%s1892_s8 + $0x30] sm:$0xff] }
  0x8d   : > { %v367_v24 = vmul.f32 %v1962_v22, %v1962_v22  ;;  %v385_v28 = vmul.f32 %v1972_v26, %v1972_v26  ;;  %v1982_v30 = vld [vmem:[%s1892_s8 + $0x38] sm:$0xff]  ;;  %v368_v31 = vmul.f32 %v1979_v29, %v1979_v29  ;;  %v1989_v33 = vld [vmem:[%s1892_s8 + $0xc0] sm:$0xff]  ;;  %v1992_v34 = vld [vmem:[%s1892_s8 + $0xc8] sm:$0xff] }
  0x8e   : > { %v369_v32 = vmul.f32 %v1982_v30, %v1982_v30  ;;  %v386_v35 = vmul.f32 %v1989_v33, %v1989_v33  ;;  %v387_v36 = vmul.f32 %v1992_v34, %v1992_v34  ;;  %v1999_v37 = vld [vmem:[%s1892_s8 + $0x40] sm:$0xff]  ;;  %v2002_v38 = vld [vmem:[%s1892_s8 + $0x48] sm:$0xff]  ;;  %v2009_v41 = vld [vmem:[%s1892_s8 + $0xd0] sm:$0xff] }
  0x8f   : > { %428 = vadd.xlane.f32.xlu0 %v379_v7  ;;  %v370_v39 = vmul.f32 %v1999_v37, %v1999_v37  ;;  %v371_v40 = vmul.f32 %v2002_v38, %v2002_v38  ;;  %v2012_v42 = vld [vmem:[%s1892_s8 + $0xd8] sm:$0xff]  ;;  %v388_v43 = vmul.f32 %v2009_v41, %v2009_v41  ;;  %v2019_v45 = vld [vmem:[%s1892_s8 + $0x50] sm:$0xff]  ;;  %v2029_v49 = vld [vmem:[%s1892_s8 + $0xe0] sm:$0xff] }
  0x90   : > { %396 = vadd.xlane.f32.xlu1 %v363_v8  ;;  %v389_v44 = vmul.f32 %v2012_v42, %v2012_v42  ;;  %v2022_v46 = vld [vmem:[%s1892_s8 + $0x58] sm:$0xff]  ;;  %v372_v47 = vmul.f32 %v2019_v45, %v2019_v45  ;;  %v2032_v50 = vld [vmem:[%s1892_s8 + $0xe8] sm:$0xff]  ;;  %v390_v51 = vmul.f32 %v2029_v49, %v2029_v49  ;;  %v2039_v53 = vld [vmem:[%s1892_s8 + $0x60] sm:$0xff] }
  0x91   : > { %v373_v48 = vmul.f32 %v2022_v46, %v2022_v46  ;;  %v391_v52 = vmul.f32 %v2032_v50, %v2032_v50  ;;  %v2042_v54 = vld [vmem:[%s1892_s8 + $0x68] sm:$0xff]  ;;  %v374_v55 = vmul.f32 %v2039_v53, %v2039_v53  ;;  %v2049_v57 = vld [vmem:[%s1892_s8 + $0xf0] sm:$0xff]  ;;  %v2052_v58 = vld [vmem:[%s1892_s8 + $0xf8] sm:$0xff] }
  0x92   : > { %v375_v56 = vmul.f32 %v2042_v54, %v2042_v54  ;;  %v392_v59 = vmul.f32 %v2049_v57, %v2049_v57  ;;  %v393_v60 = vmul.f32 %v2052_v58, %v2052_v58  ;;  %v2059_v61 = vld [vmem:[%s1892_s8 + $0x70] sm:$0xff]  ;;  %v2062_v62 = vld [vmem:[%s1892_s8 + $0x78] sm:$0xff] }
  0x93   : > { %430 = vadd.xlane.f32.xlu0 %v380_v11  ;;  %v376_v63 = vmul.f32 %v2059_v61, %v2059_v61  ;;  %v377_v0 = vmul.f32 %v2062_v62, %v2062_v62  ;;  %v2068_v4 = vld [vmem:[#allocation7] sm:$0xff] }
  0x94   : > { %432 = vadd.xlane.f32.xlu1 %v381_v12  ;;  %1218 = vmatprep.mubr.f32.mxu0 %v2068_v4 }
  0x97   : > { %398 = vadd.xlane.f32.xlu0 %v364_v15 }
  0x98   : > { %400 = vadd.xlane.f32.xlu1 %v365_v16 }
  0x9b   : > { %434 = vadd.xlane.f32.xlu0 %v382_v19 }
  0x9c   : > { %436 = vadd.xlane.f32.xlu1 %v383_v20 }
  0x9f   : > { %402 = vadd.xlane.f32.xlu0 %v366_v23 }
  0xa0   : > { %404 = vadd.xlane.f32.xlu1 %v367_v24 }
  0xa3   : > { %438 = vadd.xlane.f32.xlu0 %v384_v27 }
  0xa4   : > { %440 = vadd.xlane.f32.xlu1 %v385_v28 }
  0xa7   : > { %406 = vadd.xlane.f32.xlu0 %v368_v31 }
  0xa8   : > { %408 = vadd.xlane.f32.xlu1 %v369_v32 }
  0xab   : > { %442 = vadd.xlane.f32.xlu0 %v386_v35 }
  0xac   : > { %444 = vadd.xlane.f32.xlu1 %v387_v36 }
  0xaf   : > { %410 = vadd.xlane.f32.xlu0 %v370_v39  ;;  %v2072_v39 = vstv %s1902_s18 }
  0xb0   : > { %412 = vadd.xlane.f32.xlu1 %v371_v40 }
  0xb3   : > { %446 = vadd.xlane.f32.xlu0 %v388_v43 }
  0xb4   : > { %448 = vadd.xlane.f32.xlu1 %v389_v44 }
  0xb7   : > { %414 = vadd.xlane.f32.xlu0 %v372_v47 }
  0xb8   : > { %416 = vadd.xlane.f32.xlu1 %v373_v48 }
  0xbb   : > { %450 = vadd.xlane.f32.xlu0 %v390_v51 }
  0xbc   : > { %452 = vadd.xlane.f32.xlu1 %v391_v52 }
  0xbf   : > { %418 = vadd.xlane.f32.xlu0 %v374_v55 }
  0xc0   : > { %420 = vadd.xlane.f32.xlu1 %v375_v56 }
  0xc3   : > { %454 = vadd.xlane.f32.xlu0 %v392_v59 }
  0xc4   : > { %456 = vadd.xlane.f32.xlu1 %v393_v60 }
  0xc7   : > { %422 = vadd.xlane.f32.xlu0 %v376_v63 }
  0xc8   : > { %424 = vadd.xlane.f32.xlu1 %v377_v0 }
 0x118   : > { %v427_v5 = vpop.xlane.xlu0 %426 }
 0x119   : > { %v395_v7 = vpop.xlane.xlu1 %394  ;;  %v474_v8 = vmax.f32 %v427_v5, 1e-24 }
 0x11a   : > { %v458_v11 = vmax.f32 %v395_v7, 1e-24 }
 0x11b   : > { %1362 = vrsqrt.f32 %v474_v8 }
 0x11c   : > { %1364 = vrsqrt.f32 %v458_v11  ;;  %v429_v12 = vpop.xlane.xlu0 %428 }
 0x11d   : > { %v397_v15 = vpop.xlane.xlu1 %396  ;;  %v475_v16 = vmax.f32 %v429_v12, 1e-24 }
 0x11e   : > { %v459_v19 = vmax.f32 %v397_v15, 1e-24 }
 0x11f   : > { %1366 = vrsqrt.f32 %v475_v16 }
 0x120   : > { %1368 = vrsqrt.f32 %v459_v19  ;;  %v431_v20 = vpop.xlane.xlu0 %430 }
 0x121   : > { %v433_v23 = vpop.xlane.xlu1 %432  ;;  %v476_v24 = vmax.f32 %v431_v20, 1e-24 }
 0x122   : > { %v477_v27 = vmax.f32 %v433_v23, 1e-24 }
 0x123   : > { %1370 = vrsqrt.f32 %v476_v24 }
 0x124   : > { %1372 = vrsqrt.f32 %v477_v27  ;;  %v399_v28 = vpop.xlane.xlu0 %398 }
 0x125   : > { %v401_v31 = vpop.xlane.xlu1 %400  ;;  %v1363_v32 = vpop.eup %1362  ;;  %v460_v35 = vmax.f32 %v399_v28, 1e-24 }
 0x126   : > { %v461_v36 = vmax.f32 %v401_v31, 1e-24  ;;  %v1365_v40 = vpop.eup %1364  ;;  %v539_v47 = vmul.f32 %v1363_v32, %v2072_v39 }
 0x127   : > { %1374 = vrsqrt.f32 %v460_v35  ;;  %v523_v55 = vmul.f32 %v1365_v40, %v2072_v39 }
 0x128   : > { %1376 = vrsqrt.f32 %v461_v36  ;;  %v435_v43 = vpop.xlane.xlu0 %434  ;;  %v571_v5 = vmul.f32 %v539_v47, %v1909_v1 }
 0x129   : > { %v437_v44 = vpop.xlane.xlu1 %436  ;;  %v1367_v48 = vpop.eup %1366  ;;  %v478_v51 = vmax.f32 %v435_v43, 1e-24  ;;  %v555_v15 = vmul.f32 %v523_v55, %v1912_v2 }
 0x12a   : > { %v479_v52 = vmax.f32 %v437_v44, 1e-24  ;;  %v1369_v56 = vpop.eup %1368  ;;  %v540_v59 = vmul.f32 %v1367_v48, %v2072_v39 }
 0x12b   : > { %1378 = vrsqrt.f32 %v478_v51  ;;  %v524_v60 = vmul.f32 %v1369_v56, %v2072_v39 }
 0x12c   : > { %1380 = vrsqrt.f32 %v479_v52  ;;  %v403_v63 = vpop.xlane.xlu0 %402  ;;  %v572_v7 = vmul.f32 %v540_v59, %v1915_v3 }
 0x12d   : > { %v405_v0 = vpop.xlane.xlu1 %404  ;;  %v1371_v8 = vpop.eup %1370  ;;  %v462_v11 = vmax.f32 %v403_v63, 1e-24  ;;  %v556_v16 = vmul.f32 %v524_v60, %v1922_v6 }
 0x12e   : > { %v463_v12 = vmax.f32 %v405_v0, 1e-24  ;;  %v1373_v19 = vpop.eup %1372  ;;  %v1241_v20 = vpack.c.bf16 %v572_v7, %v571_v5  ;;  %v541_v23 = vmul.f32 %v1371_v8, %v2072_v39 }
 0x12f   : > { %1382 = vrsqrt.f32 %v462_v11  ;;  %v1243_v24 = vpack.c.bf16 %v556_v16, %v555_v15  ;;  %v542_v27 = vmul.f32 %v1373_v19, %v2072_v39 }
 0x130   : > { %1384 = vrsqrt.f32 %v463_v12  ;;  %1242 = vmatprep.subr.bf16.mxu0 %v1241_v20  ;;  %v439_v1 = vpop.xlane.xlu0 %438  ;;  %v573_v3 = vmul.f32 %v541_v23, %v1929_v9 }
 0x131   : > { %v441_v28 = vpop.xlane.xlu1 %440  ;;  %v1375_v31 = vpop.eup %1374  ;;  %v480_v32 = vmax.f32 %v439_v1, 1e-24  ;;  %1244 = vmatpush3.bf16.xpose.msra.mxu0 %v1243_v24  ;;  %v574_v6 = vmul.f32 %v542_v27, %v1932_v10 }
 0x132   : > { %v481_v2 = vmax.f32 %v441_v28, 1e-24  ;;  %v1377_v35 = vpop.eup %1376  ;;  %v525_v36 = vmul.f32 %v1375_v31, %v2072_v39 }
 0x133   : > { %1386 = vrsqrt.f32 %v480_v32  ;;  %v1245_v40 = vpack.c.bf16 %v574_v6, %v573_v3  ;;  %v526_v43 = vmul.f32 %v1377_v35, %v2072_v39 }
 0x134   : > { %1388 = vrsqrt.f32 %v481_v2  ;;  %v407_v44 = vpop.xlane.xlu0 %406  ;;  %v557_v48 = vmul.f32 %v525_v36, %v1939_v13 }
 0x135   : > { %v409_v47 = vpop.xlane.xlu1 %408  ;;  %v1379_v51 = vpop.eup %1378  ;;  %v464_v9 = vmax.f32 %v407_v44, 1e-24  ;;  %1246 = vmatprep.subr.bf16.mxu0 %v1245_v40  ;;  %v558_v55 = vmul.f32 %v526_v43, %v1942_v14 }
 0x136   : > { %v465_v52 = vmax.f32 %v409_v47, 1e-24  ;;  %v1381_v56 = vpop.eup %1380  ;;  %v543_v10 = vmul.f32 %v1379_v51, %v2072_v39 }
 0x137   : > { %1390 = vrsqrt.f32 %v464_v9  ;;  %v1247_v59 = vpack.c.bf16 %v558_v55, %v557_v48  ;;  %v544_v60 = vmul.f32 %v1381_v56, %v2072_v39 }
 0x138   : > { %1392 = vrsqrt.f32 %v465_v52  ;;  %v443_v63 = vpop.xlane.xlu0 %442  ;;  %v575_v5 = vmul.f32 %v543_v10, %v1949_v17 }
 0x139   : > { %v445_v0 = vpop.xlane.xlu1 %444  ;;  %v1383_v7 = vpop.eup %1382  ;;  %v482_v13 = vmax.f32 %v443_v63, 1e-24  ;;  %1248 = vmatpush3.bf16.xpose.msra.mxu0 %v1247_v59  ;;  %v576_v11 = vmul.f32 %v544_v60, %v1952_v18 }
 0x13a   : > { %v483_v8 = vmax.f32 %v445_v0, 1e-24  ;;  %v1385_v12 = vpop.eup %1384  ;;  %v527_v14 = vmul.f32 %v1383_v7, %v2072_v39 }
 0x13b   : > { %1394 = vrsqrt.f32 %v482_v13  ;;  %v1249_v15 = vpack.c.bf16 %v576_v11, %v575_v5  ;;  %v528_v16 = vmul.f32 %v1385_v12, %v2072_v39 }
 0x13c   : > { %1396 = vrsqrt.f32 %v483_v8  ;;  %v411_v19 = vpop.xlane.xlu0 %410  ;;  %v559_v23 = vmul.f32 %v527_v14, %v1959_v21 }
 0x13d   : > { %v413_v20 = vpop.xlane.xlu1 %412  ;;  %v1387_v24 = vpop.eup %1386  ;;  %v466_v17 = vmax.f32 %v411_v19, 1e-24  ;;  %1250 = vmatprep.subr.bf16.mxu0 %v1249_v15  ;;  %v560_v1 = vmul.f32 %v528_v16, %v1962_v22 }
 0x13e   : > { %v467_v27 = vmax.f32 %v413_v20, 1e-24  ;;  %v1389_v28 = vpop.eup %1388  ;;  %v545_v18 = vmul.f32 %v1387_v24, %v2072_v39 }
 0x13f   : > { %1398 = vrsqrt.f32 %v466_v17  ;;  %v1251_v3 = vpack.c.bf16 %v560_v1, %v559_v23  ;;  %v546_v31 = vmul.f32 %v1389_v28, %v2072_v39 }
 0x140   : > { %1400 = vrsqrt.f32 %v467_v27  ;;  %v447_v32 = vpop.xlane.xlu0 %446  ;;  %v577_v6 = vmul.f32 %v545_v18, %v1969_v25 }
 0x141   : > { %v449_v2 = vpop.xlane.xlu1 %448  ;;  %v1391_v35 = vpop.eup %1390  ;;  %v484_v21 = vmax.f32 %v447_v32, 1e-24  ;;  %1252 = vmatpush3.bf16.xpose.msra.mxu0 %v1251_v3  ;;  %v578_v40 = vmul.f32 %v546_v31, %v1972_v26 }
 0x142   : > { %v485_v36 = vmax.f32 %v449_v2, 1e-24  ;;  %v1393_v43 = vpop.eup %1392  ;;  %v529_v22 = vmul.f32 %v1391_v35, %v2072_v39 }
 0x143   : > { %1402 = vrsqrt.f32 %v484_v21  ;;  %v1253_v44 = vpack.c.bf16 %v578_v40, %v577_v6  ;;  %v530_v47 = vmul.f32 %v1393_v43, %v2072_v39 }
 0x144   : > { %1404 = vrsqrt.f32 %v485_v36  ;;  %v415_v48 = vpop.xlane.xlu0 %414  ;;  %v561_v9 = vmul.f32 %v529_v22, %v1979_v29 }
 0x145   : > { %v417_v51 = vpop.xlane.xlu1 %416  ;;  %v1395_v52 = vpop.eup %1394  ;;  %v468_v25 = vmax.f32 %v415_v48, 1e-24  ;;  %1254 = vmatprep.subr.bf16.mxu0 %v1253_v44  ;;  %v562_v56 = vmul.f32 %v530_v47, %v1982_v30 }
 0x146   : > { %v469_v55 = vmax.f32 %v417_v51, 1e-24  ;;  %v1397_v10 = vpop.eup %1396  ;;  %v547_v26 = vmul.f32 %v1395_v52, %v2072_v39 }
 0x147   : > { %1406 = vrsqrt.f32 %v468_v25  ;;  %v1255_v59 = vpack.c.bf16 %v562_v56, %v561_v9  ;;  %v548_v60 = vmul.f32 %v1397_v10, %v2072_v39 }
 0x148   : > { %1408 = vrsqrt.f32 %v469_v55  ;;  %v451_v63 = vpop.xlane.xlu0 %450  ;;  %v579_v5 = vmul.f32 %v547_v26, %v1989_v33 }
 0x149   : > { %v453_v0 = vpop.xlane.xlu1 %452  ;;  %v1399_v7 = vpop.eup %1398  ;;  %v486_v29 = vmax.f32 %v451_v63, 1e-24  ;;  %1256 = vmatpush3.bf16.xpose.msra.mxu0 %v1255_v59  ;;  %v580_v8 = vmul.f32 %v548_v60, %v1992_v34 }
 0x14a   : > { %v487_v13 = vmax.f32 %v453_v0, 1e-24  ;;  %v1401_v11 = vpop.eup %1400  ;;  %v531_v30 = vmul.f32 %v1399_v7, %v2072_v39 }
 0x14b   : > { %1410 = vrsqrt.f32 %v486_v29  ;;  %v1257_v12 = vpack.c.bf16 %v580_v8, %v579_v5  ;;  %v532_v14 = vmul.f32 %v1401_v11, %v2072_v39 }
 0x14c   : > { %1412 = vrsqrt.f32 %v487_v13  ;;  %v419_v15 = vpop.xlane.xlu0 %418  ;;  %v563_v19 = vmul.f32 %v531_v30, %v1999_v37 }
 0x14d   : > { %v421_v16 = vpop.xlane.xlu1 %420  ;;  %v1403_v20 = vpop.eup %1402  ;;  %v470_v33 = vmax.f32 %v419_v15, 1e-24  ;;  %1258 = vmatprep.subr.bf16.mxu0 %v1257_v12  ;;  %v564_v24 = vmul.f32 %v532_v14, %v2002_v38  ;;  %v667_v14 = vlaneseq }
 0x14e   : > { %v471_v23 = vmax.f32 %v421_v16, 1e-24  ;;  %v1405_v17 = vpop.eup %1404  ;;  %v549_v34 = vmul.f32 %v1403_v20, %v2072_v39 }
 0x14f   : > { %1414 = vrsqrt.f32 %v470_v33  ;;  %v1259_v27 = vpack.c.bf16 %v564_v24, %v563_v19  ;;  %v550_v1 = vmul.f32 %v1405_v17, %v2072_v39  ;;  %v2143_v19 = vand.u32 127, %v667_v14  ;;  %v677_v17 = vld [vmem:[#allocation2] sm:$0xff] }
 0x150   : > { %1416 = vrsqrt.f32 %v471_v23  ;;  %v455_v28 = vpop.xlane.xlu0 %454  ;;  %v581_v3 = vmul.f32 %v549_v34, %v2009_v41 }
 0x151   : > { %v457_v18 = vpop.xlane.xlu1 %456  ;;  %v1407_v31 = vpop.eup %1406  ;;  %v488_v37 = vmax.f32 %v455_v28, 1e-24  ;;  %1260 = vmatpush3.bf16.xpose.msra.mxu0 %v1259_v27  ;;  %v582_v2 = vmul.f32 %v550_v1, %v2012_v42  ;;  %v669_v23 = vadd.s32 128, %v2143_v19  ;;  %v678_v27 = vld [vmem:[#allocation2 + $0x8] sm:$0xff] }
 0x152   : > { %v489_v32 = vmax.f32 %v457_v18, 1e-24  ;;  %v1409_v6 = vpop.eup %1408  ;;  %v533_v38 = vmul.f32 %v1407_v31, %v2072_v39 }
 0x153   : > { %1418 = vrsqrt.f32 %v488_v37  ;;  %v1261_v35 = vpack.c.bf16 %v582_v2, %v581_v3  ;;  %v534_v21 = vmul.f32 %v1409_v6, %v2072_v39  ;;  %v688_v37 = vld [vmem:[%s2264_s3] sm:$0xff] (!%p1176_p10) }
 0x154   : > { %1420 = vrsqrt.f32 %v489_v32  ;;  %v423_v36 = vpop.xlane.xlu0 %422  ;;  %v565_v43 = vmul.f32 %v533_v38, %v2019_v45  ;;  %v689_v32 = vld [vmem:[#allocation10] sm:$0xff] (!%p1176_p10)  ;;  %v691_v2 = vmul.f32 (!%p1176_p10), %v688_v37, %v688_v37  ;;  %v1664_v38 = vmov (!%p1176_p10), 0.0  }
 0x155   : > { %v425_v40 = vpop.xlane.xlu1 %424  ;;  %v1411_v22 = vpop.eup %1410  ;;  %v472_v41 = vmax.f32 %v423_v36, 1e-24  ;;  %1262 = vmatprep.subr.bf16.mxu0 %v1261_v35  ;;  %v566_v47 = vmul.f32 %v534_v21, %v2022_v46  ;;  %v697_v6 = vmul.f32 (!%p1176_p10), %v689_v32, %v689_v32  ;;  %1231 = vmatprep.subr.mxu1 (!%p1176_p10), %v1664_v38 }
 0x156   : > { %v473_v44 = vmax.f32 %v425_v40, 1e-24  ;;  %v1413_v48 = vpop.eup %1412  ;;  %v551_v42 = vmul.f32 %v1411_v22, %v2072_v39  ;;  %692 = vadd.xlane.f32.xlu0 (!%p1176_p10), %v691_v2  ;;  %1233 = vmatprep.mubr.msk.f32.mxu1 (!%p1176_p10), %vm1665_vm2, %v1664_v38 }
 0x157   : > { %1422 = vrsqrt.f32 %v472_v41  ;;  %v1263_v51 = vpack.c.bf16 %v566_v47, %v565_v43  ;;  %v552_v9 = vmul.f32 %v1413_v48, %v2072_v39  ;;  %v687_v41 = vld [vmem:[#allocation7] sm:$0xff] (!%p1176_p10)  ;;  %v2162_v48 = vshrl.u32 (!%p1176_p10), %v667_v14, 7 }
 0x158   : > { %1424 = vrsqrt.f32 %v473_v44  ;;  %v583_v52 = vmul.f32 %v551_v42, %v2029_v49 }
 0x159   : > { %v1415_v25 = vpop.eup %1414  ;;  %1264 = vmatpush3.bf16.xpose.msra.mxu0 %v1263_v51  ;;  %v584_v45 = vmul.f32 %v552_v9, %v2032_v50  ;;  %vm705_vm3 = vcmp.eq.s32.totalorder (!%p1176_p10), %v2162_v48, %v2143_v19 }
 0x15a   : > { %v1417_v55 = vpop.eup %1416  ;;  %v535_v56 = vmul.f32 %v1415_v25, %v2072_v39  ;;  %698 = vadd.xlane.f32.xlu0 (!%p1176_p10), %v697_v6 }
 0x15b   : > { %v1265_v10 = vpack.c.bf16 %v584_v45, %v583_v52  ;;  %v536_v46 = vmul.f32 %v1417_v55, %v2072_v39 }
 0x15c   : > { %v567_v26 = vmul.f32 %v535_v56, %v2039_v53 }
 0x15d   : > { %v1419_v59 = vpop.eup %1418  ;;  %1266 = vmatprep.subr.bf16.mxu0 %v1265_v10  ;;  %v568_v60 = vmul.f32 %v536_v46, %v2042_v54 }
 0x15e   : > { %v1421_v63 = vpop.eup %1420  ;;  %v553_v0 = vmul.f32 %v1419_v59, %v2072_v39 }
 0x15f   : > { %v1267_v49 = vpack.c.bf16 %v568_v60, %v567_v26  ;;  %v554_v5 = vmul.f32 %v1421_v63, %v2072_v39 }
 0x160   : > { %v585_v50 = vmul.f32 %v553_v0, %v2049_v57  ;;  %v2140_v57 = vstv %s1904_s10 }
 0x161   : > { %v1423_v7 = vpop.eup %1422  ;;  %1268 = vmatpush3.bf16.xpose.msra.mxu0 %v1267_v49  ;;  %v586_v29 = vmul.f32 %v554_v5, %v2052_v58 }
 0x162   : > { %v1425_v13 = vpop.eup %1424  ;;  %v537_v53 = vmul.f32 %v1423_v7, %v2072_v39 }
 0x163   : > { %v1269_v8 = vpack.c.bf16 %v586_v29, %v585_v50  ;;  %v538_v54 = vmul.f32 %v1425_v13, %v2072_v39  ;;  %v1177_v50 = vld [vmem:[%s2266_s5] ss:$0 sm:$0xff] (!%p1176_p10) }
 0x164   : > { %v569_v11 = vmul.f32 %v537_v53, %v2059_v61 }
 0x165   : > { %1270 = vmatprep.subr.bf16.mxu0 %v1269_v8  ;;  %v570_v30 = vmul.f32 %v538_v54, %v2062_v62  ;;  %v670_v62 = vstv %s1175_s11 }
 0x166   : > { %v672_v24 = vadd.s32 %v670_v62, %v669_v23 }
 0x167   : > { %v1271_v12 = vpack.c.bf16 %v570_v30, %v569_v11 }
 0x168   : > { %vm674_vm1 = vcmp.lt.s32.totalorder %v672_v24, 600 }
 0x169   : > { %1272 = vmatpush3.bf16.xpose.msra.mxu0 %v1271_v12 }
 0x16a   : > { %1226 = vmatprep.subr.mxu0 (!%p1176_p10), %v1664_v38 }
 0x170   : > { %1219 = vmatmul.mubr.f32.vlgmr.msra.gmra.mrb[0].mxu0 %v2068_v4  ;;  %v671_v4 = vadd.s32 %v670_v62, %v2143_v19 }
 0x171   : > { %1228 = vmatprep.mubr.msk.f32.mxu0 (!%p1176_p10), %vm1665_vm2, %v1664_v38 }
 0x172   : > { %vm673_vm0 = vcmp.lt.s32.totalorder %v671_v4, 600 }
 0x1e3   : > { %v693_v35 = vpop.xlane.xlu0 (!%p1176_p10), %692 }
 0x1e4   : > { %v694_v21 = vadd.f32 (!%p1176_p10), 1e-12, %v693_v35 }
 0x1e7   : > { %v699_v36 = vpop.xlane.xlu0 (!%p1176_p10), %698 }
 0x1e8   : > { %v700_v40 = vmax.f32 (!%p1176_p10), %v699_v36, 1e-24 }
 0x243   : > { %v654_v58 = vpop.f32.mrb[0].mxu0 }
 0x244   : > { %v660_v15 = vsub.f32 %v654_v58, %v2140_v57  ;;  %v656_v16 = vpop.f32.mrb[1].mxu0 }
 0x245   : > { %v661_v20 = vsub.f32 %v656_v16, %v2140_v57 }
 0x246   : > { %v662_v33 = vmul.f32 1.442695, %v660_v15 }
 0x247   : > { %v664_v61 = vmul.f32 1.442695, %v661_v20 }
 0x248   : > { %1426 = vpow2.f32 %v662_v33 }
 0x249   : > { %1428 = vpow2.f32 %v664_v61 }
 0x24a   : > { %1430 = vrsqrt.f32 (!%p1176_p10), %v694_v21 }
 0x24b   : > { %1432 = vrsqrt.f32 (!%p1176_p10), %v700_v40 }
 0x251   : > { %686 = sbr.rel (%p1176_p10) target bundleno = 1279 (0x4ff), region = 68 }
 0x252   : > { %v1427_v34 = vpop.eup %1426 }
 0x253   : > { %v1429_v1 = vpop.eup %1428  ;;  %v675_v28 = vsel %vm673_vm0, %v1427_v34, 0.0 }
 0x254   : > { %v679_v18 = vadd.f32 %v677_v17, %v675_v28  ;;  %v676_v3 = vsel %vm674_vm1, %v1429_v1, 0.0  ;;  %v1431_v43 = vpop.eup (!%p1176_p10), %1430 }
 0x255   : > { %v680_v31 = vadd.f32 %v678_v27, %v676_v3  ;;  %v696_v22 = vmul.f32 (!%p1176_p10), %v1431_v43, %v688_v37  ;;  %v1433_v44 = vpop.eup (!%p1176_p10), %1432 }
 0x256   : > { %681 = vst [vmem:[#allocation2] sm:$0xff] %v679_v18  ;;  %v702_v47 = vmul.f32 (!%p1176_p10), %v1433_v44, %v689_v32 }
 0x257   : > { %682 = vst [vmem:[#allocation2 + $0x8] sm:$0xff] %v680_v31  ;;  %1227 = vmatpush3.xpose.msra.mxu0 (!%p1176_p10), %v696_v22 }
 0x258   : > { %1236 = vmatprep.subr.mxu0 %v1664_v38  ;;  %1232 = vmatpush3.xpose.msra.mxu1 %v702_v47 }
 0x25a   : > { %1229 = vmatmul.mubr.f32.vlgmr.msra.gmra.mrb[0].mxu0 %v687_v41 }
 0x25b   : > { %1237 = vmatpush3.xpose.msra.mxu0 %v702_v47  ;;  %1238 = vmatprep.mubr.msk.f32.mxu0 %vm1665_vm2, %v1664_v38 }
 0x25c   : > { %1234 = vmatmul.mubr.f32.vlgmr.msra.gmra.mrb[0].mxu1 %v687_v41 }
 0x25d   : > { %v898_v33 = vld [vmem:[#allocation2] sm:$0xff] }
 0x25e   : > { %1239 = vmatmul.mubr.f32.vlgmr.msra.gmra.mrb[2].mxu0 %v688_v37  ;;  %v899_v61 = vld [vmem:[#allocation2 + $0x8] sm:$0xff] }
 0x25f   : > { %v900_v23 = vadd.f32 %v899_v61, %v898_v33 }
 0x32d   : > { %v772_v42 = vpop.f32.mrb[0].mxu0 }
 0x32e   : > { %v795_v51 = vmul.f32 %v772_v42, %v2072_v39  ;;  %v1230_v9 = vpop.f32.mrb[1].mxu0  ;;  %v776_v52 = vsel %vm705_vm3, %v772_v42, 0.0 }
 0x32f   : > { %v778_v25 = vsel %vm777_vm4, %v776_v52, 0.0  ;;  %v883_v55 = vpop.f32.mrb[0].mxu1 }
 0x330   : > { %779 = vadd.xlane.f32.xlu0 %v778_v25  ;;  %v796_v45 = vsub.f32 %v795_v51, %v2140_v57  ;;  %v887_v10 = vmul.f32 %v883_v55, %v2072_v39  ;;  %v1235_v59 = vpop.f32.mrb[1].mxu1 }
 0x331   : > { %v983_v56 = vpop.f32.mrb[2].mxu0 }
 0x332   : > { %v987_v46 = vmul.f32 %v983_v56, %v2072_v39  ;;  %v1240_v26 = vpop.f32.mrb[3].mxu0  ;;  %v888_v60 = vsub.f32 %v887_v10, %v2140_v57  ;;  %v797_v0 = vmul.f32 1.442695, %v796_v45 }
 0x334   : > { %v988_v63 = vsub.f32 %v987_v46, %v2140_v57  ;;  %v889_v49 = vmul.f32 1.442695, %v888_v60 }
 0x336   : > { %v989_v5 = vsel %vm777_vm4, %v988_v63, -inf  ;;  %1434 = vpow2.f32 %v889_v49  ;;  %v1001_v11 = vsel %vm705_vm3, %v988_v63, 0.0 }
 0x337   : > { %990 = vmax.xlane.f32.xlu1 %v989_v5  ;;  %1436 = vpow2.f32 %v797_v0  ;;  %v1002_v30 = vsel %vm777_vm4, %v1001_v11, 0.0 }
 0x340   : > { %v1435_v7 = vpop.eup %1434 }
 0x341   : > { %v1437_v29 = vpop.eup %1436  ;;  %v897_v13 = vmul.f32 %v1435_v7, %v1177_v50 }
 0x342   : > { %v802_v8 = vsel %vm705_vm3, %v1437_v29, 0.0  ;;  %v799_v4 = vsel %vm777_vm4, %v1437_v29, 0.0 }
 0x343   : > { %v903_v53 = vsel %vm777_vm4, %v897_v13, 0.0  ;;  %v803_v54 = vsel %vm777_vm4, %v802_v8, 0.0 }
 0x344   : > { %904 = vadd.xlane.f32.xlu0 %v903_v53 }
 0x348   : > { %804 = vadd.xlane.f32.xlu0 %v803_v54 }
 0x34c   : > { %1003 = vadd.xlane.f32.xlu0 %v1002_v30 }
 0x3bd   : > { %v780_v34 = vpop.xlane.xlu0 %779 }
 0x3c4   : > { %v991_v12 = vpop.xlane.xlu1 %990 }
 0x3c5   : > { %v992_v14 = vsub.f32 %v988_v63, %v991_v12  ;;  %vm1019_vm5 = vcmp.eq.f32.partialorder %v988_v63, %v991_v12 }
 0x3c6   : > { %v1020_v58 = vsel %vm1019_vm5, %v2143_v19, 8  ;;  %v781_v19 = vsub.f32 0.0, %v780_v34 }
 0x3c7   : > { %v993_v15 = vmul.f32 1.442695, %v992_v14  ;;  %v1021_v16 = vsel %vm777_vm4, %v1020_v58, 2147483647 }
 0x3c8   : > { %v1023_v20 = vshra.s32 %v1021_v16, 16  ;;  %v782_v27 = vmul.f32 %v781_v19, %v2072_v39  ;;  %v1022_v18 = vand.u32 65535, %v1021_v16 }
 0x3c9   : > { %1438 = vpow2.f32 %v993_v15 }
 0x3ca   : > { %v1025_v62 = vcvt.s32.f32 %v1023_v20  ;;  %v783_v1 = vadd.f32 %v782_v27, %v2140_v57  ;;  %v1024_v32 = vcvt.s32.f32 %v1022_v18 }
 0x3cc   : > { %1026 = vmin.xlane.f32.xlu1 %v1025_v62  ;;  %v784_v28 = vmul.f32 1.442695, %v783_v1 }
 0x3ce   : > { %1440 = vpow2.f32 %v784_v28 }
 0x3d0   : > { %901 = vadd.xlane.f32.xlu1 %v900_v23 }
 0x3d1   : > { %v905_v2 = vpop.xlane.xlu0 %904 }
 0x3d3   : > { %v1439_v24 = vpop.eup %1438 }
 0x3d4   : > { %800 = vadd.xlane.f32.xlu1 %v799_v4  ;;  %v995_v17 = vsel %vm777_vm4, %v1439_v24, 0.0 }
 0x3d5   : > { %v805_v43 = vpop.xlane.xlu0 %804 }
 0x3d8   : > { %996 = vadd.xlane.f32.xlu1 %v995_v17  ;;  %v1441_v3 = vpop.eup %1440 }
 0x3d9   : > { %v786_v31 = vrot.slane %v1441_v3, 4  ;;  %v1004_v0 = vpop.xlane.xlu0 %1003 }
 0x3db   : > { %v787_v35 = vadd.f32 %v1441_v3, %v786_v31 }
 0x3dd   : > { %v788_v39 = vrot.slane %v787_v35, 2 }
 0x3df   : > { %v789_v44 = vadd.f32 %v788_v39, %v787_v35 }
 0x3e1   : > { %v790_v42 = vrot.slane %v789_v44, 1 }
 0x3e3   : > { %v791_v9 = vadd.f32 %v790_v42, %v789_v44 }
 0x3e5   : > { %v792_v56 = vadd.f32 1.0, %v791_v9 }
 0x459   : > { %v2195_v37 = vpop.xlane.xlu1 %1026 }
 0x45a   : > { %vm1028_vm6 = vcmp.eq.f32.partialorder %v1025_v62, %v2195_v37  ;;  %v1033_v34 = vcvt.f32.s32 %v2195_v37 }
 0x45b   : > { %v1029_v6 = vsel %vm1028_vm6, %v1024_v32, inf }
 0x45c   : > { %1030 = vmin.xlane.f32.xlu1 %v1029_v6  ;;  %v1034_v27 = vshll.u32 %v1033_v34, 16 }
 0x45d   : > { %v902_v21 = vpop.xlane.xlu1 %901 }
 0x45e   : > { %v906_v36 = vsub.f32 %v902_v21, %v905_v2 }
 0x460   : > { %v907_v40 = vadd.f32 1.0, %v906_v36 }
 0x461   : > { %v801_v57 = vpop.xlane.xlu1 %800 }
 0x462   : > { %1442 = vlog2.f32 %v907_v40  ;;  %v806_v22 = vsub.f32 %v801_v57, %v805_v43 }
 0x464   : > { %v807_v41 = vadd.f32 1.0, %v806_v22 }
 0x465   : > { %v997_v47 = vpop.xlane.xlu1 %996 }
 0x466   : > { %1444 = vlog2.f32 %v807_v41 }
 0x467   : > { %1446 = vlog2.f32 %v997_v47 }
 0x468   : > { %1448 = vlog2.f32 %v792_v56 }
 0x46c   : > { %v1443_v51 = vpop.eup %1442 }
 0x46d   : > { %v909_v52 = vmul.f32 0.6931472, %v1443_v51 }
 0x46f   : > { %v910_v25 = vrot.slane %v909_v52, 4 }
 0x470   : > { %v1445_v45 = vpop.eup %1444 }
 0x471   : > { %v1447_v55 = vpop.eup %1446  ;;  %v911_v10 = vadd.f32 %v910_v25, %v909_v52  ;;  %v809_v46 = vmul.f32 0.6931472, %v1445_v45 }
 0x472   : > { %v999_v26 = vmul.f32 0.6931472, %v1447_v55  ;;  %v1449_v15 = vpop.eup %1448 }
 0x473   : > { %v912_v59 = vrot.slane %v911_v10, 2  ;;  %v810_v60 = vrot.slane %v809_v46, 4  ;;  %v794_v33 = vmul.f32 0.6931472, %v1449_v15 }
 0x474   : > { %v1000_v63 = vadd.f32 %v999_v26, %v991_v12 }
 0x475   : > { %v913_v49 = vadd.f32 %v912_v59, %v911_v10  ;;  %v811_v5 = vadd.f32 %v810_v60, %v809_v46 }
 0x476   : > { %v1005_v50 = vsub.f32 %v1000_v63, %v1004_v0 }
 0x477   : > { %v812_v7 = vrot.slane %v811_v5, 2  ;;  %v914_v29 = vrot.slane %v913_v49, 1 }
 0x478   : > { %v1006_v13 = vrot.slane %v1005_v50, 4 }
 0x479   : > { %v813_v53 = vadd.f32 %v812_v7, %v811_v5  ;;  %v915_v11 = vadd.f32 %v914_v29, %v913_v49 }
 0x47a   : > { %v1007_v8 = vadd.f32 %v1006_v13, %v1005_v50 }
 0x47b   : > { %v814_v54 = vrot.slane %v813_v53, 1  ;;  %v916_v16 = vmul.f32 0.125, %v915_v11 }
 0x47c   : > { %v1008_v30 = vrot.slane %v1007_v8, 2 }
 0x47d   : > { %v815_v14 = vadd.f32 %v814_v54, %v813_v53  ;;  %v1013_v62 = vadd.f32 %v916_v16, %v794_v33 }
 0x47e   : > { %v1009_v58 = vadd.f32 %v1008_v30, %v1007_v8 }
 0x47f   : > { %v816_v12 = vmul.f32 0.125, %v815_v14 }
 0x480   : > { %v1010_v20 = vrot.slane %v1009_v58, 1 }
 0x481   : > { %v1014_v4 = vadd.f32 %v1013_v62, %v816_v12 }
 0x482   : > { %v1011_v61 = vadd.f32 %v1010_v20, %v1009_v58 }
 0x484   : > { %v1012_v23 = vmul.f32 0.125, %v1011_v61 }
 0x486   : > { %v1015_v24 = vmul.f32 0.5, %v1012_v23 }
 0x488   : > { %v1016_v17 = vadd.f32 %v1015_v24, %v1014_v4 }
 0x48a   : > { %1018 = vst.msk [vmem:[#allocation11] sm:$0x1] %vm1017_vm7, %v1016_v17 }
 0x4e9   : > { %v1031_v19 = vpop.xlane.xlu1 %1030 }
 0x4ea   : > { %v1032_v1 = vcvt.f32.s32 %v1031_v19 }
 0x4ec   : > { %v1035_v28 = vadd.s32 %v1034_v27, %v1032_v1 }
 0x4ee   : > { %vm1036_vm8 = vcmp.eq.s32.totalorder %v1035_v28, %v2162_v48 }
 0x4ef   : > { %v1178_v18 = vsel %vm1036_vm8, 1.0, %v1664_v38 }
 0x4f0   : > { %v1039_v3 = vrot.slane %v1178_v18, 4 }
 0x4f2   : > { %v1040_v31 = vadd.f32 %v1178_v18, %v1039_v3 }
 0x4f4   : > { %v1041_v32 = vrot.slane %v1040_v31, 2 }
 0x4f6   : > { %v1042_v2 = vadd.f32 %v1041_v32, %v1040_v31 }
 0x4f8   : > { %v1043_v6 = vrot.slane %v1042_v2, 1 }
 0x4fa   : > { %v1044_v35 = vadd.f32 %v1043_v6, %v1042_v2 }
 0x4fc   : > { %v1045_v21 = vmul.f32 12.5, %v1044_v35 }
 0x4fe   : > { %1046 = vst.msk [vmem:[#allocation12] sm:$0x1] %vm1017_vm7, %v1045_v21 }
 0x4ff PF: > { %p1316_p13 = scmp.eq.s32.totalorder %s1727_s28, 2  ;;  %s1666_s27 = smov [#allocation11]  }
 0x500   : > { %s1054_s17 = sshll.u32 %s1666_s27, 4  ;;  %s1667_s20 = smov [#allocation12]   ;;  %s1055_s17 = int_to_ptr.vmem [resolvable:$true] %s1054_s17 }
 0x501   : > { %s1065_s21 = sshll.u32 %s1667_s20, 4  ;;  %s1549_s15 = scalar_lea.vmem %s1055_s17, 16  ;;  %s1066_s21 = int_to_ptr.vmem [resolvable:$true] %s1065_s21 }
 0x502   : > { %p1550_p3 = scmp.ne.s32.totalorder %s1055_s17, %s1549_s15  ;;  %s1555_s22 = scalar_lea.vmem %s1055_s17, 32 }
 0x503   : > { %p1556_p0 = scmp.lt.s32.totalorder %s1055_s17, %s1055_s17  ;;  %p1557_p4 = scmp.lt.s32.totalorder %s1555_s22, %s1549_s15 }
 0x504   : > { %p1551_p6 = pnand %p1550_p3, %p1316_p13 }
 0x505   : > { %p1558_p11 = por %p1557_p4, %p1556_p0 }
 0x506   : > { %p1552_p7 = pneg %p1551_p6 }
 0x508   : > { %p1559_p12 = pnand %p1558_p11, %p1552_p7 }
 0x50a   : > { %1562 = shalt.err (!%p1559_p12)
}
 0x50b   : > { %s1563_s30 = scalar_lea.hbm %s2267_s6, 16 }
 0x50c   : > { %p1564_p1 = scmp.ne.s32.totalorder %s2267_s6, %s1563_s30  ;;  %p1569_p8 = scmp.lt.u32.totalorder %s1563_s30, %s2267_s6 }
 0x50e   : > { %p1565_p2 = pnand %p1564_p1, %p1316_p13 }
 0x510   : > { %p1566_p5 = pneg %p1565_p2 }
 0x512   : > { %p1571_p9 = pnand %p1569_p8, %p1566_p5 }
 0x514   : > { %1574 = shalt.err (!%p1571_p9)
}
 0x515   : > { %1288 = dma.vmem_to_hbm [thread:$0]  (%p1316_p13), %s1055_s17, 16, %s2267_s6, [#allocation5]  }
 0x516   : > { %s1575_s13 = scalar_lea.vmem %s1066_s21, 16  ;;  %s1581_s24 = scalar_lea.vmem %s1066_s21, 32 }
 0x517   : > { %p1576_p10 = scmp.ne.s32.totalorder %s1066_s21, %s1575_s13  ;;  %p1582_p7 = scmp.lt.s32.totalorder %s1066_s21, %s1066_s21 }
 0x518   : > { %p1583_p0 = scmp.lt.s32.totalorder %s1581_s24, %s1575_s13 }
 0x519   : > { %p1577_p3 = pnand %p1576_p10, %p1316_p13 }
 0x51a   : > { %p1584_p4 = por %p1583_p0, %p1582_p7 }
 0x51b   : > { %p1578_p6 = pneg %p1577_p3 }
 0x51d   : > { %p1585_p11 = pnand %p1584_p4, %p1578_p6 }
 0x51f   : > { %1588 = shalt.err (!%p1585_p11)
}
 0x520   : > { %s1589_s20 = scalar_lea.hbm %s2268_s7, 16 }
 0x521   : > { %p1590_p12 = scmp.ne.s32.totalorder %s2268_s7, %s1589_s20  ;;  %p1595_p5 = scmp.lt.u32.totalorder %s1589_s20, %s2268_s7 }
 0x523   : > { %p1591_p1 = pnand %p1590_p12, %p1316_p13 }
 0x525   : > { %p1592_p2 = pneg %p1591_p1 }
 0x527   : > { %p1597_p8 = pnand %p1595_p5, %p1592_p2 }
 0x529   : > { %1600 = shalt.err (!%p1597_p8)
}
 0x52a   : > { %1290 = dma.vmem_to_hbm [thread:$0]  (%p1316_p13), %s1066_s21, 16, %s2268_s7, [#allocation13]  }
 0x52b   : > { %1634 = dma.done.wait (%p1316_p13), [#allocation5], 16  }
 0x52c   : > { %1636 = vsyncadd (%p1316_p13), [#allocation5], 4294967280 }
 0x52d   : > { %1638 = dma.done.wait (%p1316_p13), [#allocation13], 16  }
 0x52e   : > { %1640 = vsyncadd (%p1316_p13), [#allocation13], 4294967280 }
 0x52f PF: > { %p22_p9 = scmp.ge.s32.totalorder %s1730_s29, 5   ;;  %s2290_s24 = smov %s1647_s25 }
 0x530   : > { %s2291_s25 = smov %s1651_s26  ;;  %s2292_s26 = smov %s1740_s9 }
 0x531   : > { %s2293_s27 = smov %s1730_s29  ;;  %24 = sbr.rel (!%p22_p9) target bundleno = 7 (0x7), region = 111 }
 0x538   :  { %1082 = vsyncpa [#allocation4], 1 }
 0x539   :  { %1084 = vsyncpa [#allocation4 + $0x1], 1 }
 0x53a   :  { %1085 = vsyncpa [#allocation9], 1 }
 0x53b   :  { %1087 = vsyncpa [#allocation9 + $0x1], 1 }
 0x53c   :  { %1088 = vsyncpa [#allocation5], 1 }
 0x53d   :  { %1090 = vsyncpa [#allocation5 + $0x1], 1 }
 0x53e   :  { %1091 = vsyncpa [#allocation13], 1 }
 0x53f   :  { %1092 = vsyncpa [#allocation6], 1 }
 0x540   :  { %1094 = vsyncpa [#allocation6 + $0x1], 1 }

</bundles_post_ra>
